<compile_context>
chip_gen: v6e
topology: v6e:2x2x1
jax: 0.10.0
libtpu: 0.0.40
codegen_flags: <defaults>
</compile_context>

<pallas_src>
import jax
import jax.numpy as jnp
from jax import lax
from jax.experimental import pallas as pl
from jax.experimental.pallas import tpu as pltpu

DROPOUT_P = 0.5  # F.dropout default
_KEEP_SCALE = 1.0 / (1.0 - DROPOUT_P)


def _hash_u32(x):
    """Murmur3-style 32-bit finalizer (portable VPU integer ops)."""
    x = x ^ (x >> 16)
    x = x * jnp.uint32(0x7FEB352D)
    x = x ^ (x >> 15)
    x = x * jnp.uint32(0x846CA68B)
    x = x ^ (x >> 16)
    return x


def _model_kernel(seed_ref, x1_ref, x2_ref, o_ref):
    a = x1_ref[...]  # (BB, M, K) f32
    w = x2_ref[...]  # (BB, K, N) f32
    bb, m, _ = a.shape
    n = w.shape[-1]

    # v1 = x1 @ x2 : batched MXU matmul, bf16 operands, f32 accumulation.
    v1 = jnp.einsum(
        "bmk,bkn->bmn",
        a.astype(jnp.bfloat16),
        w.astype(jnp.bfloat16),
        preferred_element_type=jnp.float32,
    )  # (BB, M, N) f32

    # ---- dropout(v1), p = 0.5, training=True ----------------------------------
    # Counter-based hash PRNG: one draw for the whole (BB, M, N) block, seeded once
    # per grid step.  Matches torch dropout's *distribution*, not its bit pattern.
    step = lax.convert_element_type(pl.program_id(0), jnp.uint32)
    seed = lax.convert_element_type(seed_ref[0], jnp.uint32)
    key = seed * jnp.uint32(0x9E3779B1) + (step + jnp.uint32(1)) * jnp.uint32(0x85EBCA77)

    i0 = lax.broadcasted_iota(jnp.int32, (bb, m, n), 0).astype(jnp.uint32)
    i1 = lax.broadcasted_iota(jnp.int32, (bb, m, n), 1).astype(jnp.uint32)
    i2 = lax.broadcasted_iota(jnp.int32, (bb, m, n), 2).astype(jnp.uint32)
    lin = i0 * jnp.uint32(m * n) + i1 * jnp.uint32(n) + i2

    bits = _hash_u32(lin ^ key)
    keep = (bits >> 31) == jnp.uint32(0)  # top bit of mixed word -> P(keep) = 0.5
    v2 = jnp.where(keep, v1 * jnp.float32(_KEEP_SCALE), jnp.float32(0.0))

    # ---- softmax(v2, axis=-1) in f32 -------------------------------------------
    mx = jnp.max(v2, axis=-1, keepdims=True)
    e = jnp.exp(v2 - mx)
    s = jnp.sum(e, axis=-1, keepdims=True)
    # TODO(synk): pl.reciprocal(s, approx=True) would use the (idle) EUP slot on TPU,
    # but it has no portable interpret lowering; plain divide keeps this runnable.
    v3 = e / s

    # v4 = v3 @ v1 (pre-dropout v1, as in the PyTorch model).
    v4 = jnp.einsum(
        "bmn,bnk->bmk",
        v3.astype(jnp.bfloat16),
        v1.astype(jnp.bfloat16),
        preferred_element_type=jnp.float32,
    )
    o_ref[...] = v4.astype(o_ref.dtype)


def model_forward(x1, x2, seed=0, block_b=None):
    B, M, K = x1.shape
    B2, K2, N = x2.shape
    assert B == B2 and K == K2
    # torch.matmul(v3, v1) with v3, v1 both (B, M, N) is only valid when N == M.
    assert N == M, "matmul(v3, v1) requires the last dim of x2 to equal M"

    if block_b is None:
        block_b = B  # whole batch in one grid step at small sizes
    assert B % block_b == 0
    grid = (B // block_b,)

    seed_arr = jnp.array([seed], dtype=jnp.int32)

    return pl.pallas_call(
        _model_kernel,
        out_shape=jax.ShapeDtypeStruct((B, M, N), jnp.float32),
        grid=grid,
        in_specs=[
            pl.BlockSpec(memory_space=pltpu.MemorySpace.SMEM),       # seed (1,)
            pl.BlockSpec((block_b, M, K), lambda i: (i, 0, 0)),       # x1 block
            pl.BlockSpec((block_b, K, N), lambda i: (i, 0, 0)),       # x2 block
        ],
        out_specs=pl.BlockSpec((block_b, M, N), lambda i: (i, 0, 0)),
        compiler_params=pltpu.CompilerParams(
            dimension_semantics=("parallel",),  # batch steps are independent (v7x 2 TCs)
        ),
    )(seed_arr, x1, x2)


if __name__ == "__main__":
    # Small shapes consistent with the module's forward.  N must equal M for the
    # second matmul (v3 @ v1) to be well-defined (the original 60x3 globals would
    # raise a shape error in PyTorch); M = N = 128 keeps the output lane-dense.
    B, M, K, N = 2, 128, 64, 128

    key = jax.random.PRNGKey(0)
    k1, k2 = jax.random.split(key)
    x1 = jax.random.normal(k1, (B, M, K), dtype=jnp.float32)
    x2 = jax.random.normal(k2, (B, K, N), dtype=jnp.float32)

    out = model_forward(x1, x2, seed=0)
    jax.block_until_ready(out)

    assert out.shape == (B, M, N)
    assert bool(jnp.all(jnp.isfinite(out)))
    print("KERNEL_OK")
</pallas_src>

<mosaic_0001>
module attributes {stable_mosaic.version = 11 : i64} {
  func.func @_model_kernel(%arg0: i32, %arg1: memref<1xi32, #tpu.memory_space<smem>>, %arg2: memref<2x128x64xf32, #tpu.memory_space<vmem>>, %arg3: memref<2x64x128xf32, #tpu.memory_space<vmem>>, %arg4: memref<2x128x128xf32, #tpu.memory_space<vmem>>) attributes {dimension_semantics = [#tpu.dimension_semantics<parallel>], iteration_bounds = array<i64: 1>, scalar_prefetch = 0 : i64, scratch_operands = 0 : i64, tpu.core_type = #tpu.core_type<tc>, window_params = [{transform_indices = @transform_0, window_bounds = array<i64: 1>}, {transform_indices = @transform_1, window_bounds = array<i64: 2, 128, 64>}, {transform_indices = @transform_2, window_bounds = array<i64: 2, 64, 128>}, {transform_indices = @transform_3, window_bounds = array<i64: 2, 128, 128>}]} {
    %c0 = arith.constant 0 : index
    %c0_0 = arith.constant 0 : index
    %c0_1 = arith.constant 0 : index
    %0 = vector.load %arg2[%c0, %c0_0, %c0_1] : memref<2x128x64xf32, #tpu.memory_space<vmem>>, vector<2x128x64xf32>
    %c0_2 = arith.constant 0 : index
    %c0_3 = arith.constant 0 : index
    %c0_4 = arith.constant 0 : index
    %1 = vector.load %arg3[%c0_2, %c0_3, %c0_4] : memref<2x64x128xf32, #tpu.memory_space<vmem>>, vector<2x64x128xf32>
    %2 = arith.truncf %0 : vector<2x128x64xf32> to vector<2x128x64xbf16>
    %3 = arith.truncf %1 : vector<2x64x128xf32> to vector<2x64x128xbf16>
    "tpu.trace_start"() <{level = 10 : i32, message = "bmk,bkn->bmn"}> : () -> ()
    %cst = arith.constant dense<0.000000e+00> : vector<2x128x128xf32>
    %4 = tpu.matmul %2, %3, %cst {dimension_numbers = #tpu.dot_dimension_numbers<[2], [1], [1], [2], [0, 0, 0, 1, 1, 2], [0], [0]>} : vector<2x128x64xbf16>, vector<2x64x128xbf16>, vector<2x128x128xf32> -> vector<2x128x128xf32>
    "tpu.trace_stop"() : () -> ()
    %c0_5 = arith.constant 0 : index
    %5 = memref.load %arg1[%c0_5] : memref<1xi32, #tpu.memory_space<smem>>
    %c-1640531535_i32 = arith.constant -1640531535 : i32
    %6 = arith.muli %5, %c-1640531535_i32 : i32
    %c1_i32 = arith.constant 1 : i32
    %7 = arith.addi %arg0, %c1_i32 : i32
    %c-2048144777_i32 = arith.constant -2048144777 : i32
    %8 = arith.muli %7, %c-2048144777_i32 : i32
    %9 = arith.addi %6, %8 : i32
    %10 = tpu.iota {dimensions = array<i32: 0>} : vector<2x128x128xi32>
    %11 = tpu.iota {dimensions = array<i32: 1>} : vector<2x128x128xi32>
    %12 = tpu.iota {dimensions = array<i32: 2>} : vector<2x128x128xi32>
    %c16384_i32 = arith.constant 16384 : i32
    %13 = vector.broadcast %c16384_i32 : i32 to vector<2x128x128xi32>
    %14 = arith.muli %10, %13 : vector<2x128x128xi32>
    %c128_i32 = arith.constant 128 : i32
    %15 = vector.broadcast %c128_i32 : i32 to vector<2x128x128xi32>
    %16 = arith.muli %11, %15 : vector<2x128x128xi32>
    %17 = arith.addi %14, %16 : vector<2x128x128xi32>
    %18 = arith.addi %17, %12 : vector<2x128x128xi32>
    %19 = vector.broadcast %9 : i32 to vector<2x128x128xi32>
    %20 = arith.xori %18, %19 : vector<2x128x128xi32>
    %c16_i32 = arith.constant 16 : i32
    %21 = vector.broadcast %c16_i32 : i32 to vector<2x128x128xi32>
    %22 = arith.shrui %20, %21 : vector<2x128x128xi32>
    %23 = arith.xori %20, %22 : vector<2x128x128xi32>
    %c2146121005_i32 = arith.constant 2146121005 : i32
    %24 = vector.broadcast %c2146121005_i32 : i32 to vector<2x128x128xi32>
    %25 = arith.muli %23, %24 : vector<2x128x128xi32>
    %c15_i32 = arith.constant 15 : i32
    %26 = vector.broadcast %c15_i32 : i32 to vector<2x128x128xi32>
    %27 = arith.shrui %25, %26 : vector<2x128x128xi32>
    %28 = arith.xori %25, %27 : vector<2x128x128xi32>
    %c-2073254261_i32 = arith.constant -2073254261 : i32
    %29 = vector.broadcast %c-2073254261_i32 : i32 to vector<2x128x128xi32>
    %30 = arith.muli %28, %29 : vector<2x128x128xi32>
    %c16_i32_6 = arith.constant 16 : i32
    %31 = vector.broadcast %c16_i32_6 : i32 to vector<2x128x128xi32>
    %32 = arith.shrui %30, %31 : vector<2x128x128xi32>
    %33 = arith.xori %30, %32 : vector<2x128x128xi32>
    %c31_i32 = arith.constant 31 : i32
    %34 = vector.broadcast %c31_i32 : i32 to vector<2x128x128xi32>
    %35 = arith.shrui %33, %34 : vector<2x128x128xi32>
    %c0_i32 = arith.constant 0 : i32
    %36 = vector.broadcast %c0_i32 : i32 to vector<2x128x128xi32>
    %37 = arith.cmpi eq, %35, %36 : vector<2x128x128xi32>
    %cst_7 = arith.constant 2.000000e+00 : f32
    %38 = vector.broadcast %cst_7 : f32 to vector<2x128x128xf32>
    %39 = arith.mulf %4, %38 : vector<2x128x128xf32>
    %cst_8 = arith.constant 0.000000e+00 : f32
    %40 = vector.broadcast %cst_8 : f32 to vector<2x128x128xf32>
    %41 = arith.select %37, %39, %40 : vector<2x128x128xi1>, vector<2x128x128xf32>
    %cst_9 = arith.constant dense<0xFF800000> : vector<2x128xf32>
    %42 = vector.multi_reduction <maximumf>, %41, %cst_9 [2] : vector<2x128x128xf32> to vector<2x128xf32>
    %43 = vector.shape_cast %42 : vector<2x128xf32> to vector<2x128x1xf32>
    %44 = vector.broadcast %43 : vector<2x128x1xf32> to vector<2x128x128xf32>
    %45 = arith.subf %41, %44 : vector<2x128x128xf32>
    %46 = math.exp %45 : vector<2x128x128xf32>
    %cst_10 = arith.constant dense<0.000000e+00> : vector<2x128xf32>
    %47 = vector.multi_reduction <add>, %46, %cst_10 [2] : vector<2x128x128xf32> to vector<2x128xf32>
    %48 = vector.shape_cast %47 : vector<2x128xf32> to vector<2x128x1xf32>
    %49 = vector.broadcast %48 : vector<2x128x1xf32> to vector<2x128x128xf32>
    %50 = arith.divf %46, %49 : vector<2x128x128xf32>
    %51 = arith.truncf %50 : vector<2x128x128xf32> to vector<2x128x128xbf16>
    %52 = arith.truncf %4 : vector<2x128x128xf32> to vector<2x128x128xbf16>
    "tpu.trace_start"() <{level = 10 : i32, message = "bmn,bnk->bmk"}> : () -> ()
    %cst_11 = arith.constant dense<0.000000e+00> : vector<2x128x128xf32>
    %53 = tpu.matmul %51, %52, %cst_11 {dimension_numbers = #tpu.dot_dimension_numbers<[2], [1], [1], [2], [0, 0, 0, 1, 1, 2], [0], [0]>} : vector<2x128x128xbf16>, vector<2x128x128xbf16>, vector<2x128x128xf32> -> vector<2x128x128xf32>
    "tpu.trace_stop"() : () -> ()
    %c0_12 = arith.constant 0 : index
    %c0_13 = arith.constant 0 : index
    %c0_14 = arith.constant 0 : index
    %54 = vector.load %arg4[%c0_12, %c0_13, %c0_14] : memref<2x128x128xf32, #tpu.memory_space<vmem>>, vector<2x128x128xf32>
    tpu.vector_store %arg4[%c0_12, %c0_13, %c0_14], %53 {strides = array<i32>} : memref<2x128x128xf32, #tpu.memory_space<vmem>>, vector<2x128x128xf32>,
    return
  }
  func.func @transform_0(%arg0: i32) -> i32 {
    %c0_i32 = arith.constant 0 : i32
    %c0_i32_0 = arith.constant 0 : i32
    return %c0_i32 : i32
  }
  func.func @transform_1(%arg0: i32) -> (i32, i32, i32) {
    %c0_i32 = arith.constant 0 : i32
    %c0_i32_0 = arith.constant 0 : i32
    %c0_i32_1 = arith.constant 0 : i32
    return %arg0, %c0_i32, %c0_i32_0 : i32, i32, i32
  }
  func.func @transform_2(%arg0: i32) -> (i32, i32, i32) {
    %c0_i32 = arith.constant 0 : i32
    %c0_i32_0 = arith.constant 0 : i32
    %c0_i32_1 = arith.constant 0 : i32
    return %arg0, %c0_i32, %c0_i32_0 : i32, i32, i32
  }
  func.func @transform_3(%arg0: i32) -> (i32, i32, i32) {
    %c0_i32 = arith.constant 0 : i32
    %c0_i32_0 = arith.constant 0 : i32
    %c0_i32_1 = arith.constant 0 : i32
    return %arg0, %c0_i32, %c0_i32_0 : i32, i32, i32
  }
}

</mosaic_0001>

<bundles_post_ra>
// kernel: tpu_custom_call.1
= control target key start
LH: loop header
LB: loop body
LE: loop exit
PB: predicated region body
PF: predicated region fallthrough
CT: control target
= control target key end

     0   :  { %vm89_vm0 = vcmask 523264   ;;  %s2744_s0 = inlined_call_operand.<no memory space> [shape: s32[1], index: 0, kind: input, shape index: {}]   ;;  %s2745_s1 = inlined_call_operand.vmem [shape: f32[2,128,64], index: 1, kind: input, shape index: {}]   ;;  %s2746_s2 = inlined_call_operand.vmem [shape: f32[2,64,128], index: 2, kind: input, shape index: {}]   ;;  %s2747_s3 = inlined_call_operand.hbm [shape: f32[2,128,128], index: 3, kind: output, shape index: {}]  }
   0x1   :  { %v55_v0 = vld [vmem:[%s2746_s2 + $0x30] sm:$0xff]  ;;  %v56_v1 = vld [vmem:[%s2746_s2 + $0x38] sm:$0xff]  ;;  %v53_v5 = vld [vmem:[%s2746_s2 + $0x20] sm:$0xff] }
   0x2   :  { %v63_v2 = vld [vmem:[%s2746_s2 + $0x70] sm:$0xff]  ;;  %v84_v3 = vpack.c.bf16 %v56_v1, %v55_v0  ;;  %v64_v4 = vld [vmem:[%s2746_s2 + $0x78] sm:$0xff]  ;;  %v54_v6 = vld [vmem:[%s2746_s2 + $0x28] sm:$0xff] }
   0x3   :  { %v88_v7 = vpack.c.bf16 %v64_v4, %v63_v2  ;;  %v83_v8 = vpack.c.bf16 %v54_v6, %v53_v5  ;;  %v61_v9 = vld [vmem:[%s2746_s2 + $0x60] sm:$0xff]  ;;  %v62_v10 = vld [vmem:[%s2746_s2 + $0x68] sm:$0xff]  ;;  %v51_v11 = vld [vmem:[%s2746_s2 + $0x10] sm:$0xff] }
   0x4   :  { %1471 = vmatprep.subr.bf16.mxu0 %v84_v3  ;;  %v87_v12 = vpack.c.bf16 %v62_v10, %v61_v9  ;;  %v52_v13 = vld [vmem:[%s2746_s2 + $0x18] sm:$0xff]  ;;  %v59_v14 = vld [vmem:[%s2746_s2 + $0x50] sm:$0xff]  ;;  %v49_v17 = vld [vmem:[%s2746_s2] sm:$0xff] }
   0x5   :  { %v60_v15 = vld [vmem:[%s2746_s2 + $0x58] sm:$0xff]  ;;  %1495 = vmatprep.subr.bf16.mxu1 %v88_v7  ;;  %1472 = vmatpush3.bf16.msra.mxu0 %v84_v3  ;;  %v82_v16 = vpack.c.bf16 %v52_v13, %v51_v11  ;;  %v17_v18 = vld [vmem:[%s2745_s1] sm:$0xff]  ;;  %v18_v19 = vld [vmem:[%s2745_s1 + $0x8] sm:$0xff] }
   0x6   :  { %1496 = vmatpush3.bf16.msra.mxu1 %v88_v7  ;;  %1473 = vmatprep.subr.bf16.mxu0 %v83_v8  ;;  %v86_v20 = vpack.c.bf16 %v60_v15, %v59_v14  ;;  %v50_v21 = vld [vmem:[%s2746_s2 + $0x8] sm:$0xff]  ;;  %v65_v22 = vpack.c.bf16 %v18_v19, %v17_v18  ;;  %v33_v23 = vld [vmem:[%s2745_s1 + $0x80] sm:$0xff]  ;;  %v19_v30 = vld [vmem:[%s2745_s1 + $0x10] sm:$0xff] }
   0x7   :  { %1497 = vmatprep.subr.bf16.mxu1 %v87_v12  ;;  %v34_v24 = vld [vmem:[%s2745_s1 + $0x88] sm:$0xff]  ;;  %v57_v25 = vld [vmem:[%s2746_s2 + $0x40] sm:$0xff]  ;;  %v81_v28 = vpack.c.bf16 %v50_v21, %v49_v17  ;;  %v20_v31 = vld [vmem:[%s2745_s1 + $0x18] sm:$0xff] }
   0x8   :  { %v58_v26 = vld [vmem:[%s2746_s2 + $0x48] sm:$0xff]  ;;  %v73_v27 = vpack.c.bf16 %v34_v24, %v33_v23  ;;  %1479 = vmatprep.mubr.msk.bf16.mxu0 %vm89_vm0, %v65_v22  ;;  %v35_v32 = vld [vmem:[%s2745_s1 + $0x90] sm:$0xff]  ;;  %v36_v33 = vld [vmem:[%s2745_s1 + $0x98] sm:$0xff]  ;;  %v66_v38 = vpack.c.bf16 %v20_v31, %v19_v30 }
   0x9   :  { %1474 = vmatpush3.bf16.msra.mxu0 %v83_v8  ;;  %v85_v29 = vpack.c.bf16 %v58_v26, %v57_v25  ;;  %v21_v34 = vld [vmem:[%s2745_s1 + $0x20] sm:$0xff]  ;;  %v22_v35 = vld [vmem:[%s2745_s1 + $0x28] sm:$0xff]  ;;  %v74_v39 = vpack.c.bf16 %v36_v33, %v35_v32 }
   0xa   :  { %1498 = vmatpush3.bf16.msra.mxu1 %v87_v12  ;;  %1475 = vmatprep.subr.bf16.mxu0 %v82_v16  ;;  %v37_v36 = vld [vmem:[%s2745_s1 + $0xa0] sm:$0xff]  ;;  %v38_v37 = vld [vmem:[%s2745_s1 + $0xa8] sm:$0xff]  ;;  %v67_v40 = vpack.c.bf16 %v22_v35, %v21_v34 }
   0xb   :  { %1499 = vmatprep.subr.bf16.mxu1 %v86_v20  ;;  %1503 = vmatprep.mubr.msk.bf16.mxu1 %vm89_vm0, %v73_v27 }
   0xd   :  { %1476 = vmatpush3.bf16.msra.mxu0 %v82_v16 }
   0xe   :  { %1500 = vmatpush3.bf16.msra.mxu1 %v86_v20  ;;  %1477 = vmatprep.subr.bf16.mxu0 %v81_v28 }
   0xf   :  { %1501 = vmatprep.subr.bf16.mxu1 %v85_v29 }
  0x11   :  { %1478 = vmatpush3.bf16.msra.mxu0 %v81_v28 }
  0x12   :  { %9 = vsyncpa [#allocation4], 0  ;;  %1502 = vmatpush3.bf16.msra.mxu1 %v85_v29  ;;  %v75_v41 = vpack.c.bf16 %v38_v37, %v37_v36  ;;  %v23_v42 = vld [vmem:[%s2745_s1 + $0x30] sm:$0xff]  ;;  %v24_v43 = vld [vmem:[%s2745_s1 + $0x38] sm:$0xff]  ;;  %v337_v8 = vlaneseq  ;;  %s333_s27 = smul.u32 2654435761, %s2744_s0 }
  0x13   :  { %v39_v44 = vld [vmem:[%s2745_s1 + $0xb0] sm:$0xff]  ;;  %v40_v45 = vld [vmem:[%s2745_s1 + $0xb8] sm:$0xff]  ;;  %v25_v46 = vld [vmem:[%s2745_s1 + $0x40] sm:$0xff]  ;;  %v68_v50 = vpack.c.bf16 %v24_v43, %v23_v42  ;;  %s1736_s0 = smov [#allocation3]  }
  0x14   :  { %1480 = vmatmul.mubr.msk.bf16.vlgmr.msra.gmra.mxu0 %vm89_vm0, %v66_v38  ;;  %v26_v47 = vld [vmem:[%s2745_s1 + $0x48] sm:$0xff]  ;;  %v41_v48 = vld [vmem:[%s2745_s1 + $0xc0] sm:$0xff]  ;;  %v76_v51 = vpack.c.bf16 %v40_v45, %v39_v44  ;;  %v27_v54 = vld [vmem:[%s2745_s1 + $0x50] sm:$0xff]  ;;  %v1919_v9 = vshrl.u32 %v337_v8, 7  ;;  %v1925_v12 = vand.u32 127, %v337_v8  ;;  %s1388_s28 = sshll.u32 %s1736_s0, 4  ;;  %s1389_s28 = int_to_ptr.vmem [resolvable:$true] %s1388_s28 }
  0x15   :  { %1504 = vmatmul.mubr.msk.bf16.vlgmr.msra.gmra.mxu1 %vm89_vm0, %v74_v39  ;;  %1483 = vmatprep.mubr.msk.bf16.mxu0 %vm89_vm0, %v67_v40  ;;  %v42_v49 = vld [vmem:[%s2745_s1 + $0xc8] sm:$0xff]  ;;  %v69_v52 = vpack.c.bf16 %v26_v47, %v25_v46  ;;  %v28_v55 = vld [vmem:[%s2745_s1 + $0x58] sm:$0xff]  ;;  %v43_v56 = vld [vmem:[%s2745_s1 + $0xd0] sm:$0xff]  ;;  %s1714_s2 = scalar_lea.vmem %s1389_s28, 4096  ;;  %p1719_p1 = scmp.lt.s32.totalorder %s1389_s28, %s1389_s28 }
  0x16   :  { %1507 = vmatprep.mubr.msk.bf16.mxu1 %vm89_vm0, %v75_v41  ;;  %v77_v53 = vpack.c.bf16 %v42_v49, %v41_v48  ;;  %v44_v57 = vld [vmem:[%s2745_s1 + $0xd8] sm:$0xff]  ;;  %v29_v58 = vld [vmem:[%s2745_s1 + $0x60] sm:$0xff]  ;;  %v30_v59 = vld [vmem:[%s2745_s1 + $0x68] sm:$0xff]  ;;  %v70_v62 = vpack.c.bf16 %v28_v55, %v27_v54  ;;  %v340_v10 = vadd.s32 16, %v1919_v9  ;;  %v356_v13 = vmul.u32 128, %v1919_v9  ;;  %p1715_p0 = scmp.ne.s32.totalorder %s1389_s28, %s1714_s2  ;;  %p1720_p2 = scmp.lt.s32.totalorder %s1714_s2, %s1714_s2 }
  0x17   :  { %v45_v60 = vld [vmem:[%s2745_s1 + $0xe0] sm:$0xff]  ;;  %v46_v61 = vld [vmem:[%s2745_s1 + $0xe8] sm:$0xff]  ;;  %v78_v63 = vpack.c.bf16 %v44_v57, %v43_v56  ;;  %v71_v0 = vpack.c.bf16 %v30_v59, %v29_v58  ;;  %v31_v2 = vld [vmem:[%s2745_s1 + $0x70] sm:$0xff]  ;;  %v341_v15 = vadd.s32 24, %v1919_v9  ;;  %v339_v20 = vadd.s32 8, %v1919_v9 }
  0x18   :  { %v79_v1 = vpack.c.bf16 %v46_v61, %v45_v60  ;;  %v32_v3 = vld [vmem:[%s2745_s1 + $0x78] sm:$0xff]  ;;  %v47_v4 = vld [vmem:[%s2745_s1 + $0xf0] sm:$0xff]  ;;  %v358_v11 = vmul.u32 128, %v340_v10  ;;  %v372_v18 = vadd.s32 16384, %v356_v13  ;;  %v388_v25 = vadd.s32 %v356_v13, %v1925_v12  ;;  %p1721_p3 = por %p1720_p2, %p1719_p1 }
  0x19   :  { %v48_v5 = vld [vmem:[%s2745_s1 + $0xf8] sm:$0xff]  ;;  %v72_v6 = vpack.c.bf16 %v32_v3, %v31_v2  ;;  %s336_s1 = sadd.s32 2246822519, %s333_s27  ;;  %v359_v21 = vmul.u32 128, %v341_v15  ;;  %v357_v26 = vmul.u32 128, %v339_v20  ;;  %v344_v59 = vadd.s32 48, %v1919_v9 }
  0x1a   :  { %v80_v7 = vpack.c.bf16 %v48_v5, %v47_v4  ;;  %v374_v14 = vadd.s32 16384, %v358_v11  ;;  %v390_v16 = vadd.s32 %v358_v11, %v1925_v12  ;;  %v1930_v17 = vstv %s336_s1  ;;  %p1722_p4 = pnand %p1721_p3, %p1715_p0 }
  0x1b   :  { %v404_v23 = vadd.s32 %v372_v18, %v1925_v12  ;;  %v375_v27 = vadd.s32 16384, %v359_v21  ;;  %v391_v29 = vadd.s32 %v359_v21, %v1925_v12  ;;  %v421_v32 = vxor.u32 %v1930_v17, %v388_v25 }
  0x1c   :  { %1484 = vmatmul.mubr.msk.bf16.gmra.mxu0 %vm89_vm0, %v68_v50  ;;  %v406_v19 = vadd.s32 %v374_v14, %v1925_v12  ;;  %v423_v22 = vxor.u32 %v1930_v17, %v390_v16  ;;  %v373_v33 = vadd.s32 16384, %v357_v26  ;;  %v389_v40 = vadd.s32 %v357_v26, %v1925_v12 }
  0x1d   :  { %1508 = vmatmul.mubr.msk.bf16.gmra.mxu1 %vm89_vm0, %v76_v51  ;;  %1487 = vmatprep.mubr.msk.bf16.mxu0 %vm89_vm0, %v69_v52  ;;  %v437_v30 = vxor.u32 %v1930_v17, %v404_v23  ;;  %v407_v34 = vadd.s32 %v375_v27, %v1925_v12  ;;  %v424_v36 = vxor.u32 %v1930_v17, %v391_v29  ;;  %v453_v39 = vshrl.u32 %v421_v32, 16 }
  0x1e   :  { %1511 = vmatprep.mubr.msk.bf16.mxu1 %vm89_vm0, %v77_v53  ;;  %v439_v24 = vxor.u32 %v1930_v17, %v406_v19  ;;  %v455_v28 = vshrl.u32 %v423_v22, 16  ;;  %v405_v41 = vadd.s32 %v373_v33, %v1925_v12  ;;  %v422_v48 = vxor.u32 %v1930_v17, %v389_v40 }
  0x1f   :  { %v469_v37 = vshrl.u32 %v437_v30, 16  ;;  %v440_v42 = vxor.u32 %v1930_v17, %v407_v34  ;;  %v456_v44 = vshrl.u32 %v424_v36, 16  ;;  %v485_v47 = vxor.u32 %v453_v39, %v421_v32 }
  0x20   :  { %v471_v31 = vshrl.u32 %v439_v24, 16  ;;  %v487_v35 = vxor.u32 %v455_v28, %v423_v22  ;;  %v438_v49 = vxor.u32 %v1930_v17, %v405_v41  ;;  %v454_v56 = vshrl.u32 %v422_v48, 16 }
  0x21   :  { %v501_v45 = vxor.u32 %v469_v37, %v437_v30  ;;  %v472_v50 = vshrl.u32 %v440_v42, 16  ;;  %v488_v52 = vxor.u32 %v456_v44, %v424_v36  ;;  %v517_v55 = vmul.u32 2146121005, %v485_v47 }
  0x22   :  { %v503_v38 = vxor.u32 %v471_v31, %v439_v24  ;;  %v519_v43 = vmul.u32 2146121005, %v487_v35  ;;  %v470_v57 = vshrl.u32 %v438_v49, 16  ;;  %v345_v3 = vadd.s32 56, %v1919_v9 }
  0x23   :  { %v533_v53 = vmul.u32 2146121005, %v501_v45  ;;  %v504_v58 = vxor.u32 %v472_v50, %v440_v42  ;;  %v520_v61 = vmul.u32 2146121005, %v488_v52  ;;  %v342_v16 = vadd.s32 32, %v1919_v9 }
  0x24   :  { %1488 = vmatmul.mubr.msk.bf16.gmra.mxu0 %vm89_vm0, %v70_v62  ;;  %v535_v46 = vmul.u32 2146121005, %v503_v38  ;;  %v551_v51 = vshrl.u32 %v519_v43, 15  ;;  %v502_v2 = vxor.u32 %v470_v57, %v438_v49  ;;  %v362_v5 = vmul.u32 128, %v344_v59 }
  0x25   :  { %1512 = vmatmul.mubr.msk.bf16.gmra.mxu1 %vm89_vm0, %v78_v63  ;;  %1491 = vmatprep.mubr.msk.bf16.mxu0 %vm89_vm0, %v71_v0  ;;  %v565_v62 = vshrl.u32 %v533_v53, 15  ;;  %v549_v0 = vshrl.u32 %v517_v55, 15  ;;  %v536_v4 = vmul.u32 2146121005, %v504_v58  ;;  %v363_v15 = vmul.u32 128, %v345_v3 }
  0x26   :  { %1515 = vmatprep.mubr.msk.bf16.mxu1 %vm89_vm0, %v79_v1  ;;  %v567_v54 = vshrl.u32 %v535_v46, 15  ;;  %v583_v60 = vxor.u32 %v551_v51, %v519_v43  ;;  %v486_v1 = vxor.u32 %v454_v56, %v422_v48  ;;  %v534_v14 = vmul.u32 2146121005, %v502_v2 }
  0x27   :  { %v597_v8 = vxor.u32 %v565_v62, %v533_v53  ;;  %v581_v11 = vxor.u32 %v549_v0, %v517_v55  ;;  %v568_v18 = vshrl.u32 %v536_v4, 15  ;;  %v394_v19 = vadd.s32 %v362_v5, %v1925_v12 }
  0x28   :  { %v599_v63 = vxor.u32 %v567_v54, %v535_v46  ;;  %v518_v13 = vmul.u32 2146121005, %v486_v1  ;;  %v343_v20 = vadd.s32 40, %v1919_v9  ;;  %v378_v23 = vadd.s32 16384, %v362_v5 }
  0x29   :  { %v629_v24 = vmul.u32 2221713035, %v597_v8  ;;  %v613_v26 = vmul.u32 2221713035, %v581_v11  ;;  %v566_v28 = vshrl.u32 %v534_v14, 15  ;;  %v395_v29 = vadd.s32 %v363_v15, %v1925_v12 }
  0x2a   :  { %v631_v10 = vmul.u32 2221713035, %v599_v63  ;;  %v550_v27 = vshrl.u32 %v518_v13, 15  ;;  %v379_v30 = vadd.s32 16384, %v363_v15  ;;  %v360_v31 = vmul.u32 128, %v342_v16 }
  0x2b   :  { %v600_v32 = vxor.u32 %v568_v18, %v536_v4  ;;  %v427_v33 = vxor.u32 %v1930_v17, %v394_v19  ;;  %v361_v34 = vmul.u32 128, %v343_v20  ;;  %v410_v37 = vadd.s32 %v378_v23, %v1925_v12 }
  0x2c   :  { %1492 = vmatmul.mubr.msk.bf16.gmra.mxu0 %vm89_vm0, %v72_v6  ;;  %v615_v6 = vmul.u32 2221713035, %v583_v60  ;;  %v663_v25 = vshrl.u32 %v631_v10, 16  ;;  %v376_v38 = vadd.s32 16384, %v360_v31  ;;  %v661_v39 = vshrl.u32 %v629_v24, 16 }
  0x2d   :  { %1516 = vmatmul.mubr.msk.bf16.gmra.mxu1 %vm89_vm0, %v80_v7  ;;  %v552_v7 = vshrl.u32 %v520_v61, 15  ;;  %v645_v41 = vshrl.u32 %v613_v26, 16  ;;  %v582_v42 = vxor.u32 %v550_v27, %v518_v13  ;;  %v598_v43 = vxor.u32 %v566_v28, %v534_v14 }
  0x2e   :  { %v647_v21 = vshrl.u32 %v615_v6, 16  ;;  %v1958_v40 = vxor.u32 %v663_v25, %v631_v10  ;;  %v428_v44 = vxor.u32 %v1930_v17, %v395_v29  ;;  %v411_v45 = vadd.s32 %v379_v30, %v1925_v12 }
  0x2f   :  { %v584_v22 = vxor.u32 %v552_v7, %v520_v61  ;;  %v392_v46 = vadd.s32 %v360_v31, %v1925_v12  ;;  %v632_v47 = vmul.u32 2221713035, %v600_v32  ;;  %v459_v48 = vshrl.u32 %v427_v33, 16 }
  0x30   :  { %v1955_v35 = vxor.u32 %v647_v21, %v615_v6  ;;  %v393_v49 = vadd.s32 %v361_v34, %v1925_v12  ;;  %v377_v50 = vadd.s32 16384, %v361_v34  ;;  %v443_v53 = vxor.u32 %v1930_v17, %v410_v37 }
  0x31   :  { %v616_v36 = vmul.u32 2221713035, %v584_v22  ;;  %v408_v54 = vadd.s32 %v376_v38, %v1925_v12  ;;  %v1967_v55 = vxor.u32 %v661_v39, %v629_v24  ;;  %v727_v56 = vshrl.u32 %v1958_v40, 31 }
  0x32   :  { %v711_v51 = vshrl.u32 %v1955_v35, 31  ;;  %v1970_v57 = vxor.u32 %v645_v41, %v613_v26  ;;  %v614_v58 = vmul.u32 2221713035, %v582_v42  ;;  %v630_v59 = vmul.u32 2221713035, %v598_v43 }
  0x33   :  { %v648_v52 = vshrl.u32 %v616_v36, 16  ;;  %v460_v60 = vshrl.u32 %v428_v44, 16  ;;  %v444_v61 = vxor.u32 %v1930_v17, %v411_v45  ;;  %v425_v62 = vxor.u32 %v1930_v17, %v392_v46 }
  0x34   :  { %v491_v63 = vxor.u32 %v459_v48, %v427_v33  ;;  %v426_v0 = vxor.u32 %v1930_v17, %v393_v49  ;;  %v409_v1 = vadd.s32 %v377_v50, %v1925_v12  ;;  %v348_v2 = vadd.s32 80, %v1919_v9 }
  0x35   :  { %v1977_v3 = vxor.u32 %v648_v52, %v616_v36  ;;  %v664_v4 = vshrl.u32 %v632_v47, 16  ;;  %v475_v5 = vshrl.u32 %v443_v53, 16  ;;  %v441_v6 = vxor.u32 %v1930_v17, %v408_v54 }
  0x36   :  { %v725_v7 = vshrl.u32 %v1967_v55, 31  ;;  %v709_v8 = vshrl.u32 %v1970_v57, 31  ;;  %v646_v10 = vshrl.u32 %v614_v58, 16  ;;  %v349_v11 = vadd.s32 88, %v1919_v9 }
  0x37   :  { %v662_v13 = vshrl.u32 %v630_v59, 16  ;;  %v492_v14 = vxor.u32 %v460_v60, %v428_v44  ;;  %v476_v15 = vshrl.u32 %v444_v61, 16  ;;  %v457_v16 = vshrl.u32 %v425_v62, 16 }
  0x38   :  { %v523_v18 = vmul.u32 2146121005, %v491_v63  ;;  %v458_v19 = vshrl.u32 %v426_v0, 16  ;;  %v442_v20 = vxor.u32 %v1930_v17, %v409_v1  ;;  %v366_v21 = vmul.u32 128, %v348_v2 }
  0x39   :  { %v712_v22 = vshrl.u32 %v1977_v3, 31  ;;  %v1985_v23 = vxor.u32 %v664_v4, %v632_v47  ;;  %v507_v24 = vxor.u32 %v475_v5, %v443_v53  ;;  %v473_v25 = vshrl.u32 %v441_v6, 16 }
  0x3a   :  { %v1987_v26 = vxor.u32 %v646_v10, %v614_v58  ;;  %v367_v27 = vmul.u32 128, %v349_v11  ;;  %v346_v28 = vadd.s32 64, %v1919_v9  ;;  %v347_v29 = vadd.s32 72, %v1919_v9 }
  0x3b   :  { %v1991_v30 = vxor.u32 %v662_v13, %v630_v59  ;;  %v524_v31 = vmul.u32 2146121005, %v492_v14  ;;  %v508_v32 = vxor.u32 %v476_v15, %v444_v61  ;;  %v489_v33 = vxor.u32 %v457_v16, %v425_v62 }
  0x3c   :  { %v555_v34 = vshrl.u32 %v523_v18, 15  ;;  %v490_v36 = vxor.u32 %v458_v19, %v426_v0  ;;  %v474_v37 = vshrl.u32 %v442_v20, 16  ;;  %v398_v38 = vadd.s32 %v366_v21, %v1925_v12 }
  0x3d   :  { %v539_v39 = vmul.u32 2146121005, %v507_v24  ;;  %v505_v41 = vxor.u32 %v473_v25, %v441_v6  ;;  %v382_v42 = vadd.s32 16384, %v366_v21  ;;  %v383_v43 = vadd.s32 16384, %v367_v27 }
  0x3e   :  { %v728_v44 = vshrl.u32 %v1985_v23, 31  ;;  %v399_v45 = vadd.s32 %v367_v27, %v1925_v12  ;;  %v364_v46 = vmul.u32 128, %v346_v28  ;;  %v365_v47 = vmul.u32 128, %v347_v29 }
  0x3f   :  { %v710_v48 = vshrl.u32 %v1987_v26, 31  ;;  %v556_v49 = vshrl.u32 %v524_v31, 15  ;;  %v540_v50 = vmul.u32 2146121005, %v508_v32  ;;  %v521_v52 = vmul.u32 2146121005, %v489_v33 }
  0x40   :  { %v726_v53 = vshrl.u32 %v1991_v30, 31  ;;  %v522_v54 = vmul.u32 2146121005, %v490_v36  ;;  %v506_v58 = vxor.u32 %v474_v37, %v442_v20  ;;  %v431_v59 = vxor.u32 %v1930_v17, %v398_v38 }
  0x41   :  { %v587_v60 = vxor.u32 %v555_v34, %v523_v18  ;;  %v537_v61 = vmul.u32 2146121005, %v505_v41  ;;  %v414_v62 = vadd.s32 %v382_v42, %v1925_v12  ;;  %v415_v63 = vadd.s32 %v383_v43, %v1925_v12 }
  0x42   :  { %v571_v0 = vshrl.u32 %v539_v39, 15  ;;  %v432_v1 = vxor.u32 %v1930_v17, %v399_v45  ;;  %v396_v2 = vadd.s32 %v364_v46, %v1925_v12  ;;  %v397_v4 = vadd.s32 %v365_v47, %v1925_v12 }
  0x43   :  { %v588_v5 = vxor.u32 %v556_v49, %v524_v31  ;;  %v572_v6 = vshrl.u32 %v540_v50, 15  ;;  %v553_v10 = vshrl.u32 %v521_v52, 15  ;;  %v380_v11 = vadd.s32 16384, %v364_v46 }
  0x44   :  { %v554_v13 = vshrl.u32 %v522_v54, 15  ;;  %v538_v14 = vmul.u32 2146121005, %v506_v58  ;;  %v463_v15 = vshrl.u32 %v431_v59, 16  ;;  %v381_v16 = vadd.s32 16384, %v365_v47 }
  0x45   :  { %v619_v18 = vmul.u32 2221713035, %v587_v60  ;;  %v569_v19 = vshrl.u32 %v537_v61, 15  ;;  %v447_v20 = vxor.u32 %v1930_v17, %v414_v62  ;;  %v448_v21 = vxor.u32 %v1930_v17, %v415_v63 }
  0x46   :  { %v603_v24 = vxor.u32 %v571_v0, %v539_v39  ;;  %v464_v25 = vshrl.u32 %v432_v1, 16  ;;  %v429_v27 = vxor.u32 %v1930_v17, %v396_v2  ;;  %v430_v28 = vxor.u32 %v1930_v17, %v397_v4 }
  0x47   :  { %v620_v29 = vmul.u32 2221713035, %v588_v5  ;;  %v604_v31 = vxor.u32 %v572_v6, %v540_v50  ;;  %v585_v32 = vxor.u32 %v553_v10, %v521_v52  ;;  %v412_v33 = vadd.s32 %v380_v11, %v1925_v12 }
  0x48   :  { %v586_v34 = vxor.u32 %v554_v13, %v522_v54  ;;  %v570_v36 = vshrl.u32 %v538_v14, 15  ;;  %v495_v37 = vxor.u32 %v463_v15, %v431_v59  ;;  %v413_v38 = vadd.s32 %v381_v16, %v1925_v12 }
  0x49   :  { %v651_v41 = vshrl.u32 %v619_v18, 16  ;;  %v601_v42 = vxor.u32 %v569_v19, %v537_v61  ;;  %v479_v43 = vshrl.u32 %v447_v20, 16  ;;  %v480_v45 = vshrl.u32 %v448_v21, 16 }
  0x4a   :  { %v635_v39 = vmul.u32 2221713035, %v603_v24  ;;  %v496_v46 = vxor.u32 %v464_v25, %v432_v1  ;;  %v461_v47 = vshrl.u32 %v429_v27, 16  ;;  %v462_v49 = vshrl.u32 %v430_v28, 16 }
  0x4b   :  { %v652_v58 = vshrl.u32 %v620_v29, 16  ;;  %v636_v60 = vmul.u32 2221713035, %v604_v31  ;;  %v617_v62 = vmul.u32 2221713035, %v585_v32  ;;  %v445_v50 = vxor.u32 %v1930_v17, %v412_v33 }
  0x4c   :  { %v618_v52 = vmul.u32 2221713035, %v586_v34  ;;  %v602_v63 = vxor.u32 %v570_v36, %v538_v14  ;;  %v527_v54 = vmul.u32 2146121005, %v495_v37  ;;  %v446_v59 = vxor.u32 %v1930_v17, %v413_v38 }
  0x4d   :  { %v2012_v0 = vxor.u32 %v651_v41, %v619_v18  ;;  %v633_v2 = vmul.u32 2221713035, %v601_v42  ;;  %v511_v61 = vxor.u32 %v479_v43, %v447_v20  ;;  %v512_v4 = vxor.u32 %v480_v45, %v448_v21 }
  0x4e   :  { %v667_v5 = vshrl.u32 %v635_v39, 16  ;;  %v528_v6 = vmul.u32 2146121005, %v496_v46  ;;  %v493_v1 = vxor.u32 %v461_v47, %v429_v27  ;;  %v494_v10 = vxor.u32 %v462_v49, %v430_v28 }
  0x4f   :  { %v2014_v11 = vxor.u32 %v652_v58, %v620_v29  ;;  %v668_v13 = vshrl.u32 %v636_v60, 16  ;;  %v649_v15 = vshrl.u32 %v617_v62, 16  ;;  %v477_v16 = vshrl.u32 %v445_v50, 16 }
  0x50   :  { %v650_v19 = vshrl.u32 %v618_v52, 16  ;;  %v634_v24 = vmul.u32 2221713035, %v602_v63  ;;  %v559_v14 = vshrl.u32 %v527_v54, 15  ;;  %v478_v25 = vshrl.u32 %v446_v59, 16 }
  0x51   :  { %v715_v31 = vshrl.u32 %v2012_v0, 31  ;;  %v665_v18 = vshrl.u32 %v633_v2, 16  ;;  %v543_v32 = vmul.u32 2146121005, %v511_v61  ;;  %v544_v33 = vmul.u32 2146121005, %v512_v4 }
  0x52   :  { %vm2019_vm1 = vcmp.eq.s32.totalorder %v711_v51, 0  ;;  %v2023_v21 = vxor.u32 %v667_v5, %v635_v39  ;;  %v560_v27 = vshrl.u32 %v528_v6, 15  ;;  %v525_v28 = vmul.u32 2146121005, %v493_v1 }
  0x53   :  { %v526_v29 = vmul.u32 2146121005, %v494_v10  ;;  %v716_v34 = vshrl.u32 %v2014_v11, 31  ;;  %v2026_v36 = vxor.u32 %v668_v13, %v636_v60  ;;  %v509_v37 = vxor.u32 %v477_v16, %v445_v50 }
  0x54   :  { %v2029_v38 = vadd.s32 112, %v1919_v9  ;;  %v2031_v41 = vxor.u32 %v649_v15, %v617_v62  ;;  %v666_v35 = vshrl.u32 %v634_v24, 16  ;;  %v2033_v51 = vxor.u32 %v559_v14, %v527_v54 }
  0x55   :  { %v2035_v42 = vxor.u32 %v478_v25, %v446_v59  ;;  %vm2039_vm2 = vcmp.eq.s32.totalorder %v725_v7, 0  ;;  %v2043_v45 = vxor.u32 %v650_v19, %v618_v52  ;;  %v2045_v39 = vxor.u32 %v665_v18, %v633_v2 }
  0x56   :  { %v575_v46 = vshrl.u32 %v543_v32, 15  ;;  %v576_v47 = vshrl.u32 %v544_v33, 15  ;;  %vm2049_vm3 = vcmp.eq.s32.totalorder %v727_v56, 0  ;;  %v731_v58 = vshrl.u32 %v2023_v21, 31 }
  0x57   :  { %v2054_v60 = vxor.u32 %v560_v27, %v528_v6  ;;  %v557_v55 = vshrl.u32 %v525_v28, 15  ;;  %v558_v7 = vshrl.u32 %v526_v29, 15  ;;  %v732_v62 = vshrl.u32 %v2026_v36, 31 }
  0x58   :  { %v541_v50 = vmul.u32 2146121005, %v509_v37  ;;  %v370_v52 = vmul.u32 128, %v2029_v38  ;;  %v353_v63 = vadd.s32 120, %v1919_v9  ;;  %v2060_v40 = vxor.u32 %v666_v35, %v634_v24 }
  0x59   :  { %v623_v56 = vmul.u32 2221713035, %v2033_v51  ;;  %v542_v59 = vmul.u32 2146121005, %v2035_v42  ;;  %vm2066_vm4 = vcmp.eq.s32.totalorder %v712_v22, 0  ;;  %v2072_v5 = vxor.u32 %v575_v46, %v543_v32 }
  0x5a   :  { %v2074_v6 = vxor.u32 %v576_v47, %v544_v33  ;;  %vm2080_vm5 = vcmp.eq.s32.totalorder %v709_v8, 0  ;;  %v624_v3 = vmul.u32 2221713035, %v2054_v60  ;;  %v2085_v22 = vxor.u32 %v557_v55, %v525_v28 }
  0x5b   :  { %v2087_v13 = vxor.u32 %v558_v7, %v526_v29  ;;  %v350_v15 = vadd.s32 96, %v1919_v9  ;;  %v573_v24 = vshrl.u32 %v541_v50, 15  ;;  %v402_v14 = vadd.s32 %v370_v52, %v1925_v12 }
  0x5c   :  { %v371_v57 = vmul.u32 128, %v353_v63  ;;  %v655_v18 = vshrl.u32 %v623_v56, 16  ;;  %v574_v32 = vshrl.u32 %v542_v59, 15  ;;  %v351_v33 = vadd.s32 104, %v1919_v9 }
  0x5d   :  { %vm2107_vm6 = vcmp.eq.s32.totalorder %v728_v44, 0  ;;  %v2749_v38 = vmul.u32 2221713035, %v2072_v5  ;;  %v2748_v35 = vmul.u32 2221713035, %v2074_v6  ;;  %vm2119_vm7 = vcmp.eq.s32.totalorder %v710_v48, 0 }
  0x5e   :  { %v656_v23 = vshrl.u32 %v624_v3, 16  ;;  %v2750_v44 = vmul.u32 2221713035, %v2085_v22  ;;  %v368_v42 = vmul.u32 128, %v350_v15  ;;  %v2127_v60 = vxor.u32 %v573_v24, %v541_v50 }
  0x5f   :  { %v2751_v47 = vmul.u32 2221713035, %v2087_v13  ;;  %v435_v55 = vxor.u32 %v1930_v17, %v402_v14  ;;  %v403_v7 = vadd.s32 %v371_v57, %v1925_v12  ;;  %vm2140_vm8 = vcmp.eq.s32.totalorder %v715_v31, 0 }
  0x60   :  { %v369_v50 = vmul.u32 128, %v351_v33  ;;  %vm2154_vm9 = vcmp.eq.s32.totalorder %v726_v53, 0  ;;  %v2158_v31 = vxor.u32 %v574_v32, %v542_v59  ;;  %v386_v33 = vadd.s32 16384, %v370_v52 }
  0x61   :  { %v2163_v25 = vxor.u32 %v655_v18, %v623_v56  ;;  %v2165_v4 = vxor.u32 %v656_v23, %v624_v3  ;;  %v400_v49 = vadd.s32 %v368_v42, %v1925_v12  ;;  %vm2172_vm10 = vcmp.eq.s32.totalorder %v716_v34, 0 }
  0x62   :  { %v671_v53 = vshrl.u32 %v2749_v38, 16  ;;  %v672_v52 = vshrl.u32 %v2748_v35, 16  ;;  %v467_v56 = vshrl.u32 %v435_v55, 16  ;;  %v436_v59 = vxor.u32 %v1930_v17, %v403_v7 }
  0x63   :  { %vm2190_vm11 = vcmp.eq.s32.totalorder %v731_v58, 0  ;;  %v401_v18 = vadd.s32 %v369_v50, %v1925_v12  ;;  %v385_v7 = vadd.s32 16384, %v369_v50  ;;  %v418_v21 = vadd.s32 %v386_v33, %v1925_v12 }
  0x64   :  { %v433_v35 = vxor.u32 %v1930_v17, %v400_v49  ;;  %vm2219_vm12 = vcmp.eq.s32.totalorder %v732_v62, 0  ;;  %v468_v54 = vshrl.u32 %v436_v59, 16  ;;  %v719_v20 = vshrl.u32 %v2163_v25, 31 }
  0x65   :  { %v417_v37 = vadd.s32 %v385_v7, %v1925_v12  ;;  %v2824_v34 = vmul.u32 2221713035, %v2158_v31 }
  0xd4   :  { %v2076_v1 = vpop.f32.mrf.mxu0 }
  0xd5   :  { %v775_v16 = vmul.f32 2.0, %v2076_v1  ;;  %v2091_v19 = vpop.f32.mrf.mxu1 }
  0xd6   :  { %v2094_v8 = vpop.f32.mrf.mxu0  ;;  %v791_v27 = vmul.f32 2.0, %v2091_v19 }
  0xd7   :  { %v2099_v28 = vpop.f32.mrf.mxu1  ;;  %v2103_v29 = vsel %vm2019_vm1, %v775_v16, 0.0  ;;  %v384_v16 = vadd.s32 16384, %v368_v42  ;;  %v773_v24 = vmul.f32 2.0, %v2094_v8  ;;  %vm2359_vm1 = vcmp.eq.s32.totalorder %v719_v20, 0 }
  0xd8   :  { %2782 = vst [vmem:[#allocation6_spill] sm:$0xff] %v2099_v28  ;;  %2783 = vst [vmem:[#allocation7_spill] sm:$0xff] %v2103_v29  ;;  %v789_v9 = vmul.f32 2.0, %v2099_v28  ;;  %841 = vmax.xlane.f32.xlu0 %v2103_v29  ;;  %v2115_v51 = vpop.f32.mrf.mxu0  ;;  %v2150_v43 = vsel %vm2049_vm3, %v791_v27, 0.0  ;;  %v387_v27 = vadd.s32 16384, %v371_v57 }
  0xd9   :  { %v2124_v46 = vpop.f32.mrf.mxu1  ;;  %v776_v26 = vmul.f32 2.0, %v2115_v51  ;;  %2793 = vst [vmem:[#allocation11_spill] sm:$0xff] %v2150_v43  ;;  %v416_v32 = vadd.s32 %v384_v16, %v1925_v12  ;;  %v2202_v2 = vsel %vm2080_vm5, %v773_v24, 0.0  ;;  %v654_v16 = vshrl.u32 %v2751_v47, 16 }
  0xda   :  { %v2134_v48 = vsel %vm2039_vm2, %v789_v9, 0.0  ;;  %v2136_v63 = vpop.f32.mrf.mxu0  ;;  %v792_v3 = vmul.f32 2.0, %v2124_v46  ;;  %2801 = vst [vmem:[#allocation13_spill] sm:$0xff] %v2202_v2  ;;  %v419_v38 = vadd.s32 %v387_v27, %v1925_v12 }
  0xdb   :  { %2788 = vst [vmem:[#allocation8_spill] sm:$0xff] %v2134_v48  ;;  %2789 = vst [vmem:[#allocation9_spill] sm:$0xff] %v2136_v63  ;;  %869 = vmax.xlane.f32.xlu1 %v2134_v48  ;;  %v2146_v14 = vpop.f32.mrf.mxu1  ;;  %v2184_v57 = vsel %vm2066_vm4, %v776_v26, 0.0  ;;  %v774_v23 = vmul.f32 2.0, %v2136_v63  ;;  %v653_v26 = vshrl.u32 %v2750_v44, 16  ;;  %v2224_v44 = vxor.u32 %v467_v56, %v435_v55 }
  0xdc   :  { %2792 = vst [vmem:[#allocation10_spill] sm:$0xff] %v2146_v14  ;;  %873 = vmax.xlane.f32.xlu0 %v2150_v43  ;;  %v2161_v9 = vpop.f32.mrf.mxu0  ;;  %2798 = vst [vmem:[#allocation12_spill] sm:$0xff] %v2184_v57  ;;  %v790_v47 = vmul.f32 2.0, %v2146_v14  ;;  %v2229_v49 = vsel %vm2107_vm6, %v792_v3, 0.0  ;;  %v449_v36 = vxor.u32 %v1930_v17, %v416_v32  ;;  %v434_v56 = vxor.u32 %v1930_v17, %v401_v18 }
  0xdd   :  { %v2168_v61 = vpop.f32.mrf.mxu1  ;;  %v779_v10 = vmul.f32 2.0, %v2161_v9  ;;  %2804 = vst [vmem:[#allocation14_spill] sm:$0xff] %v2229_v49  ;;  %v2240_v55 = vsel %vm2119_vm7, %v774_v23, 0.0  ;;  %v451_v3 = vxor.u32 %v1930_v17, %v418_v21  ;;  %v2806_v32 = vshrl.u32 %v2031_v41, 31 }
  0xde   :  { %v2186_v11 = vpop.f32.mrf.mxu0  ;;  %2805 = vst [vmem:[#allocation15_spill] sm:$0xff] %v2240_v55  ;;  %v465_v23 = vshrl.u32 %v433_v35, 16  ;;  %v452_v18 = vxor.u32 %v1930_v17, %v419_v38  ;;  %v795_v12 = vmul.f32 2.0, %v2168_v61  ;;  %v2265_v41 = vxor.u32 %v468_v54, %v436_v59 }
  0xdf   :  { %v2197_v42 = vpop.f32.mrf.mxu1  ;;  %843 = vmax.xlane.f32.xlu1 %v2184_v57  ;;  %vm2251_vm13 = vcmp.eq.s32.totalorder %v2806_v32, 0  ;;  %v2262_v21 = vsel %vm2140_vm8, %v779_v10, 0.0  ;;  %v2269_v32 = vsel %vm2154_vm9, %v790_v47, 0.0  ;;  %v720_v38 = vshrl.u32 %v2165_v4, 31 }
  0xe0   :  { %837 = vmax.xlane.f32.xlu0 %v2202_v2  ;;  %v2206_v58 = vpop.f32.mrf.mxu0  ;;  %2809 = vst [vmem:[#allocation16_spill] sm:$0xff] %v2262_v21  ;;  %2810 = vst [vmem:[#allocation17_spill] sm:$0xff] %v2269_v32  ;;  %v2811_v48 = vmul.u32 2221713035, %v2072_v5  ;;  %v481_v43 = vshrl.u32 %v449_v36, 16  ;;  %v466_v0 = vshrl.u32 %v434_v56, 16  ;;  %v450_v4 = vxor.u32 %v1930_v17, %v417_v37 }
  0xe1   :  { %v2215_v24 = vpop.f32.mrf.mxu1  ;;  %v780_v33 = vmul.f32 2.0, %v2206_v58  ;;  %v2815_v47 = vmul.u32 2221713035, %v2074_v6  ;;  %v483_v5 = vshrl.u32 %v451_v3, 16  ;;  %v2817_v59 = vshrl.u32 %v2045_v39, 31 }
  0xe2   :  { %v2231_v27 = vpop.f32.mrf.mxu0  ;;  %v703_v57 = vxor.u32 %v671_v53, %v2811_v48  ;;  %v796_v48 = vmul.f32 2.0, %v2215_v24  ;;  %v484_v17 = vshrl.u32 %v452_v18, 16  ;;  %v2310_v37 = vsel %vm2190_vm11, %v795_v12, 0.0 }
  0xe3   :  { %v2235_v62 = vpop.f32.mrf.mxu1  ;;  %875 = vmax.xlane.f32.xlu1 %v2229_v49  ;;  %v2287_v15 = vxor.u32 %v672_v52, %v2815_v47  ;;  %vm2300_vm15 = vcmp.eq.s32.totalorder %v2817_v59, 0  ;;  %v2304_v52 = vxor.u32 %v465_v23, %v433_v35  ;;  %2820 = vst [vmem:[#allocation19_spill] sm:$0xff] %v2310_v37  ;;  %v532_v39 = vmul.u32 2146121005, %v2265_v41 }
  0xe4   :  { %839 = vmax.xlane.f32.xlu0 %v2240_v55  ;;  %v2247_v2 = vpop.f32.mrf.mxu0  ;;  %v531_v55 = vmul.u32 2146121005, %v2224_v44  ;;  %v2812_v44 = vshrl.u32 %v2043_v45, 31  ;;  %v2296_v45 = vsel %vm2172_vm10, %v780_v33, 0.0  ;;  %v2822_v59 = vmul.u32 2221713035, %v2087_v13 }
  0xe5   :  { %v2258_v7 = vpop.f32.mrf.mxu1  ;;  %2816 = vst [vmem:[#allocation18_spill] sm:$0xff] %v2296_v45  ;;  %v2823_v23 = vmul.u32 2221713035, %v2127_v60  ;;  %v2329_v12 = vshrl.u32 %v2824_v34, 16  ;;  %v2825_v13 = vshrl.u32 %v2060_v40, 31  ;;  %v735_v41 = vshrl.u32 %v703_v57, 31 }
  0xe6   :  { %v2271_v25 = vpop.f32.mrf.mxu0  ;;  %vm2281_vm14 = vcmp.eq.s32.totalorder %v2812_v44, 0  ;;  %v2821_v44 = vmul.u32 2221713035, %v2085_v22  ;;  %v563_v33 = vshrl.u32 %v531_v55, 15  ;;  %v2321_v35 = vxor.u32 %v654_v16, %v2822_v59 }
  0xe7   :  { %v2276_v29 = vpop.f32.mrf.mxu1  ;;  %871 = vmax.xlane.f32.xlu1 %v2269_v32  ;;  %v2331_v22 = vxor.u32 %v481_v43, %v449_v36  ;;  %vm2339_vm0 = vcmp.eq.s32.totalorder %v2825_v13, 0  ;;  %v2343_v59 = vxor.u32 %v466_v0, %v434_v56  ;;  %v2350_v36 = vsel %vm2219_vm12, %v796_v48, 0.0 }
  0xe8   :  { %849 = vmax.xlane.f32.xlu0 %v2262_v21  ;;  %v2292_v53 = vpop.f32.mrf.mxu0  ;;  %v2314_v30 = vxor.u32 %v653_v26, %v2821_v44  ;;  %v2325_v21 = vshrl.u32 %v2823_v23, 16  ;;  %v777_v26 = vmul.f32 2.0, %v2186_v11  ;;  %v482_v23 = vshrl.u32 %v450_v4, 16  ;;  %2828 = vst [vmem:[#allocation20_spill] sm:$0xff] %v2350_v36 }
  0xe9   :  { %v2306_v10 = vpop.f32.mrf.mxu1  ;;  %v529_v34 = vmul.u32 2146121005, %v2304_v52  ;;  %v2355_v40 = vxor.u32 %v484_v17, %v452_v18  ;;  %vm2363_vm2 = vcmp.eq.s32.totalorder %v720_v38, 0  ;;  %v2367_v0 = vxor.u32 %v563_v33, %v531_v55 }
  0xea   :  { %v2317_v47 = vpop.f32.mrf.mxu0  ;;  %v564_v50 = vshrl.u32 %v532_v39, 15  ;;  %v778_v48 = vmul.f32 2.0, %v2231_v27  ;;  %v545_v20 = vmul.u32 2146121005, %v2331_v22  ;;  %v2381_v55 = vsel %vm2251_vm13, %v777_v26, 0.0 }
  0xeb   :  { %v2334_v44 = vpop.f32.mrf.mxu1  ;;  %851 = vmax.xlane.f32.xlu1 %v2296_v45  ;;  %v2353_v45 = vxor.u32 %v483_v5, %v451_v3  ;;  %v793_v5 = vmul.f32 2.0, %v2197_v42  ;;  %2834 = vst [vmem:[#allocation22_spill] sm:$0xff] %v2381_v55  ;;  %v530_v38 = vmul.u32 2146121005, %v2343_v59  ;;  %v2384_v33 = vxor.u32 %v482_v23, %v450_v4 }
  0xec   :  { %881 = vmax.xlane.f32.xlu0 %v2310_v37  ;;  %v2346_v43 = vpop.f32.mrf.mxu0  ;;  %vm2389_vm3 = vcmp.eq.s32.totalorder %v735_v41, 0  ;;  %v561_v18 = vshrl.u32 %v529_v34, 15  ;;  %v783_v49 = vmul.f32 2.0, %v2247_v2  ;;  %v627_v59 = vmul.u32 2221713035, %v2367_v0 }
  0xed   :  { %v2357_v13 = vpop.f32.mrf.mxu1  ;;  %v547_v37 = vmul.u32 2146121005, %v2353_v45  ;;  %v2401_v23 = vxor.u32 %v564_v50, %v532_v39  ;;  %v794_v41 = vmul.f32 2.0, %v2235_v62  ;;  %v2408_v45 = vsel %vm2281_vm14, %v778_v48, 0.0 }
  0xee   :  { %2829 = vst [vmem:[#allocation21_spill] sm:$0xff] %v2357_v13  ;;  %v2370_v52 = vpop.f32.mrf.mxu0  ;;  %2838 = vst [vmem:[#allocation24_spill] sm:$0xff] %v2408_v45  ;;  %v577_v32 = vshrl.u32 %v545_v20, 15  ;;  %v2417_v39 = vsel %vm2300_vm15, %v793_v5, 0.0  ;;  %v562_v50 = vshrl.u32 %v530_v38, 15  ;;  %v784_v48 = vmul.f32 2.0, %v2292_v53 }
  0xef   :  { %v2376_v17 = vpop.f32.mrf.mxu1  ;;  %883 = vmax.xlane.f32.xlu1 %v2350_v36  ;;  %2839 = vst [vmem:[#allocation25_spill] sm:$0xff] %v2417_v39  ;;  %v546_v54 = vmul.u32 2146121005, %v2384_v33  ;;  %v799_v6 = vmul.f32 2.0, %v2258_v7  ;;  %v2431_v5 = vsel %vm2359_vm1, %v783_v49, 0.0  ;;  %v659_v33 = vshrl.u32 %v627_v59, 16 }
  0xf0   :  { %845 = vmax.xlane.f32.xlu0 %v2381_v55  ;;  %v2387_v3 = vpop.f32.mrf.mxu0  ;;  %v628_v28 = vmul.u32 2221713035, %v2401_v23  ;;  %v1154_v63 = vpack.c.bf16 %v2306_v10, %v2258_v7  ;;  %v718_v57 = vshrl.u32 %v2321_v35, 31  ;;  %v2449_v7 = vxor.u32 %v562_v50, %v530_v38 }
  0xf1   :  { %v2396_v26 = vpop.f32.mrf.mxu1  ;;  %v1148_v4 = vpack.c.bf16 %v2387_v3, %v2346_v43  ;;  %v691_v38 = vxor.u32 %v659_v33, %v627_v59  ;;  %v2846_v23 = vshrl.u32 %v2314_v30, 31  ;;  %v1145_v59 = vpack.c.bf16 %v2317_v47, %v2271_v25 }
  0xf2   :  { %2837 = vst [vmem:[#allocation23_spill] sm:$0xff] %v2396_v26  ;;  %v1156_v55 = vpack.c.bf16 %v2396_v26, %v2357_v13  ;;  %v2410_v36 = vpop.f32.mrf.mxu0  ;;  %v579_v13 = vshrl.u32 %v547_v37, 15  ;;  %v660_v56 = vshrl.u32 %v628_v28, 16  ;;  %vm2496_vm6 = vcmp.eq.s32.totalorder %v718_v57, 0 }
  0xf3   :  { %847 = vmax.xlane.f32.xlu1 %v2408_v45  ;;  %1519 = vmatprep.subr.bf16.mxu0 %v1148_v4  ;;  %v2413_v14 = vpop.f32.mrf.mxu1  ;;  %v1147_v0 = vpack.c.bf16 %v2410_v36, %v2370_v52  ;;  %v2426_v45 = vxor.u32 %v561_v18, %v529_v34  ;;  %v2440_v34 = vsel %vm2339_vm0, %v794_v41, 0.0  ;;  %v2442_v18 = vxor.u32 %v577_v32, %v545_v20  ;;  %v2855_v41 = vld [vmem:[#allocation6_spill] sm:$0xff] }
  0xf4   :  { %1551 = vmatprep.subr.bf16.mxu1 %v1156_v55  ;;  %v1155_v26 = vpack.c.bf16 %v2413_v14, %v2376_v17  ;;  %877 = vmax.xlane.f32.xlu0 %v2417_v39  ;;  %v1146_v39 = vpack.c.bf16 %v2292_v53, %v2247_v2  ;;  %v800_v2 = vmul.f32 2.0, %v2306_v10  ;;  %v2455_v53 = vsel %vm2363_vm2, %v784_v48, 0.0 }
  0xf5   :  { %1552 = vmatpush3.bf16.msra.mxu1 %v1156_v55  ;;  %1520 = vmatpush3.bf16.msra.mxu0 %v1148_v4  ;;  %v2840_v55 = vmul.u32 2221713035, %v2127_v60  ;;  %v578_v4 = vshrl.u32 %v546_v54, 15  ;;  %v2841_v32 = vmul.u32 2221713035, %v2158_v31  ;;  %v2463_v60 = vsel %vm2389_vm3, %v799_v6, 0.0 }
  0xf6   :  { %1521 = vmatprep.subr.bf16.mxu0 %v1147_v0  ;;  %1553 = vmatprep.subr.bf16.mxu1 %v1155_v26  ;;  %v625_v35 = vmul.u32 2221713035, %v2426_v45  ;;  %v2845_v20 = vmul.u32 2146121005, %v2355_v40  ;;  %vm2482_vm5 = vcmp.eq.s32.totalorder %v2846_v23, 0  ;;  %v1144_v57 = vpack.c.bf16 %v2206_v58, %v2161_v9 }
  0xf7   :  { %879 = vmax.xlane.f32.xlu1 %v2440_v34  ;;  %v701_v49 = vxor.u32 %v2325_v21, %v2840_v55  ;;  %v702_v16 = vxor.u32 %v2329_v12, %v2841_v32  ;;  %v2842_v21 = vshrl.u32 %v2287_v15, 31  ;;  %v1153_v12 = vpack.c.bf16 %v2334_v44, %v2276_v29 }
  0xf8   :  { %857 = vmax.xlane.f32.xlu0 %v2431_v5  ;;  %v580_v31 = vshrl.u32 %v2845_v20, 15  ;;  %v641_v22 = vmul.u32 2221713035, %v2442_v18  ;;  %v781_v15 = vmul.f32 2.0, %v2271_v25  ;;  %v626_v45 = vmul.u32 2221713035, %v2449_v7 }
  0xf9   :  { %1554 = vmatpush3.bf16.msra.mxu1 %v1155_v26  ;;  %1522 = vmatpush3.bf16.msra.mxu0 %v1147_v0  ;;  %vm2467_vm4 = vcmp.eq.s32.totalorder %v2842_v21, 0  ;;  %v2476_v26 = vxor.u32 %v579_v13, %v547_v37  ;;  %v2487_v0 = vxor.u32 %v578_v4, %v546_v54  ;;  %v733_v13 = vshrl.u32 %v701_v49, 31 }
  0xfa   :  { %1523 = vmatprep.subr.bf16.mxu0 %v1146_v39  ;;  %1555 = vmatprep.subr.bf16.mxu1 %v1154_v63  ;;  %v2494_v37 = vsel %vm2467_vm4, %v800_v2, 0.0  ;;  %v657_v50 = vshrl.u32 %v625_v35, 16  ;;  %v734_v48 = vshrl.u32 %v702_v16, 31  ;;  %v692_v54 = vxor.u32 %v660_v56, %v628_v28 }
  0xfb   :  { %859 = vmax.xlane.f32.xlu1 %v2455_v53  ;;  %v2851_v6 = vmov %v2845_v20  ;;  %v782_v25 = vmul.f32 2.0, %v2317_v47  ;;  %v723_v18 = vshrl.u32 %v691_v38, 31  ;;  %v673_v55 = vshrl.u32 %v641_v22, 16 }
  0xfc   :  { %889 = vmax.xlane.f32.xlu0 %v2463_v60  ;;  %v2502_v33 = vxor.u32 %v580_v31, %v2851_v6  ;;  %v643_v49 = vmul.u32 2221713035, %v2476_v26  ;;  %v658_v28 = vshrl.u32 %v626_v45, 16  ;;  %v642_v40 = vmul.u32 2221713035, %v2487_v0 }
  0xfd   :  { %1556 = vmatpush3.bf16.msra.mxu1 %v1154_v63  ;;  %1524 = vmatpush3.bf16.msra.mxu0 %v1146_v39  ;;  %v797_v63 = vmul.f32 2.0, %v2276_v29  ;;  %v2510_v39 = vsel %vm2482_vm5, %v781_v15, 0.0  ;;  %v1152_v47 = vpack.c.bf16 %v2215_v24, %v2168_v61  ;;  %vm765_vm7 = vcmp.eq.s32.totalorder %v733_v13, 0 }
  0xfe   :  { %1525 = vmatprep.subr.bf16.mxu0 %v1145_v59  ;;  %1557 = vmatprep.subr.bf16.mxu1 %v1153_v12  ;;  %v689_v7 = vxor.u32 %v657_v50, %v625_v35  ;;  %v787_v29 = vmul.f32 2.0, %v2346_v43  ;;  %vm2519_vm8 = vcmp.eq.s32.totalorder %v734_v48, 0  ;;  %v724_v2 = vshrl.u32 %v692_v54, 31  ;;  %v2857_v50 = vld [vmem:[#allocation21_spill] sm:$0xff]  ;;  %v2858_v48 = vld [vmem:[#allocation23_spill] sm:$0xff] }
  0xff   :  { %891 = vmax.xlane.f32.xlu1 %v2494_v37  ;;  %v644_v32 = vmul.u32 2221713035, %v2502_v33  ;;  %v798_v61 = vmul.f32 2.0, %v2334_v44  ;;  %v2527_v9 = vsel %vm2496_vm6, %v782_v25, 0.0  ;;  %vm755_vm9 = vcmp.eq.s32.totalorder %v723_v18, 0  ;;  %v2859_v18 = vld [vmem:[#allocation7_spill] sm:$0xff] }
 0x100   :  { %853 = vmax.xlane.f32.xlu0 %v2510_v39  ;;  %v705_v58 = vxor.u32 %v673_v55, %v641_v22  ;;  %v2530_v24 = vsel %vm765_vm7, %v797_v63, 0.0  ;;  %v690_v43 = vxor.u32 %v658_v28, %v626_v45  ;;  %v674_v16 = vshrl.u32 %v642_v40, 16  ;;  %v2856_v45 = vld [vmem:[#allocation10_spill] sm:$0xff] }
 0x101   :  { %1558 = vmatpush3.bf16.msra.mxu1 %v1153_v12  ;;  %1526 = vmatpush3.bf16.msra.mxu0 %v1145_v59  ;;  %v675_v35 = vshrl.u32 %v643_v49, 16  ;;  %v1151_v21 = vpack.c.bf16 %v2235_v62, %v2197_v42  ;;  %v1143_v44 = vpack.c.bf16 %v2231_v27, %v2186_v11  ;;  %v788_v10 = vmul.f32 2.0, %v2387_v3 }
 0x102   :  { %1527 = vmatprep.subr.bf16.mxu0 %v1144_v57  ;;  %1559 = vmatprep.subr.bf16.mxu1 %v1152_v47  ;;  %v721_v56 = vshrl.u32 %v689_v7, 31  ;;  %v2538_v20 = vsel %vm755_vm9, %v787_v29, 0.0  ;;  %vm756_vm10 = vcmp.eq.s32.totalorder %v724_v2, 0  ;;  %v2542_v31 = vsel %vm2519_vm8, %v798_v61, 0.0  ;;  %v2861_v29 = vld [vmem:[#allocation12_spill] sm:$0xff] }
 0x103   :  { %855 = vmax.xlane.f32.xlu1 %v2527_v9  ;;  %v737_v42 = vshrl.u32 %v705_v58, 31  ;;  %v676_v62 = vshrl.u32 %v644_v32, 16  ;;  %v785_v11 = vmul.f32 2.0, %v2370_v52  ;;  %v722_v27 = vshrl.u32 %v690_v43, 31  ;;  %v2863_v58 = vld [vmem:[#allocation13_spill] sm:$0xff] }
 0x104   :  { %885 = vmax.xlane.f32.xlu0 %v2530_v24  ;;  %v706_v3 = vxor.u32 %v674_v16, %v642_v40  ;;  %v707_v12 = vxor.u32 %v675_v35, %v643_v49  ;;  %v1150_v38 = vpack.c.bf16 %v2124_v46, %v2091_v19  ;;  %v1142_v22 = vpack.c.bf16 %v2115_v51, %v2076_v1  ;;  %v2854_v46 = vld [vmem:[#allocation9_spill] sm:$0xff]  ;;  %v2860_v40 = vld [vmem:[#allocation11_spill] sm:$0xff] }
 0x105   :  { %1560 = vmatpush3.bf16.msra.mxu1 %v1152_v47  ;;  %1528 = vmatpush3.bf16.msra.mxu0 %v1144_v57  ;;  %v2551_v26 = vsel %vm756_vm10, %v788_v10, 0.0  ;;  %vm753_vm11 = vcmp.eq.s32.totalorder %v721_v56, 0  ;;  %v801_v15 = vmul.f32 2.0, %v2376_v17  ;;  %v786_v52 = vmul.f32 2.0, %v2410_v36 }
 0x106   :  { %1529 = vmatprep.subr.bf16.mxu0 %v1143_v44  ;;  %1561 = vmatprep.subr.bf16.mxu1 %v1151_v21  ;;  %vm769_vm12 = vcmp.eq.s32.totalorder %v737_v42, 0  ;;  %v2556_v19 = vsel %vm753_vm11, %v785_v11, 0.0  ;;  %vm754_vm13 = vcmp.eq.s32.totalorder %v722_v27, 0  ;;  %v738_v1 = vshrl.u32 %v706_v3, 31 }
 0x107   :  { %887 = vmax.xlane.f32.xlu1 %v2542_v31  ;;  %v708_v51 = vxor.u32 %v676_v62, %v644_v32  ;;  %v1141_v23 = vpack.c.bf16 %v2854_v46, %v2094_v8  ;;  %v1149_v17 = vpack.c.bf16 %v2856_v45, %v2855_v41  ;;  %v739_v0 = vshrl.u32 %v707_v12, 31  ;;  %v2862_v32 = vld [vmem:[#allocation8_spill] sm:$0xff]  ;;  %v2865_v62 = vld [vmem:[#allocation15_spill] sm:$0xff]  ;;  %v2868_v45 = vld [vmem:[#allocation18_spill] sm:$0xff] }
 0x108   :  { %865 = vmax.xlane.f32.xlu0 %v2538_v20  ;;  %v2563_v36 = vsel %vm769_vm12, %v801_v15, 0.0  ;;  %v802_v59 = vmul.f32 2.0, %v2413_v14  ;;  %v2566_v13 = vsel %vm754_vm13, %v786_v52, 0.0  ;;  %v803_v30 = vmul.f32 2.0, %v2857_v50  ;;  %v2867_v52 = vld [vmem:[#allocation16_spill] sm:$0xff] }
 0x109   :  { %1562 = vmatpush3.bf16.msra.mxu1 %v1151_v21  ;;  %1530 = vmatpush3.bf16.msra.mxu0 %v1143_v44  ;;  %vm770_vm14 = vcmp.eq.s32.totalorder %v738_v1, 0  ;;  %v740_v8 = vshrl.u32 %v708_v51, 31  ;;  %vm771_vm15 = vcmp.eq.s32.totalorder %v739_v0, 0  ;;  %v804_v54 = vmul.f32 2.0, %v2858_v48  ;;  %v2864_v44 = vld [vmem:[#allocation14_spill] sm:$0xff] }
 0x10a   :  { %1531 = vmatprep.subr.bf16.mxu0 %v1142_v22  ;;  %1563 = vmatprep.subr.bf16.mxu1 %v1150_v38  ;;  %v2572_v6 = vsel %vm770_vm14, %v802_v59, 0.0  ;;  %v2575_v14 = vsel %vm771_vm15, %v803_v30, 0.0  ;;  %v2869_v59 = vld [vmem:[#allocation19_spill] sm:$0xff] }
 0x10b   :  { %867 = vmax.xlane.f32.xlu1 %v2551_v26  ;;  %vm772_vm0 = vcmp.eq.s32.totalorder %v740_v8, 0 }
 0x10c   :  { %861 = vmax.xlane.f32.xlu0 %v2556_v19  ;;  %v2578_v33 = vsel %vm772_vm0, %v804_v54, 0.0 }
 0x10d   :  { %1564 = vmatpush3.bf16.msra.mxu1 %v1150_v38  ;;  %1532 = vmatpush3.bf16.msra.mxu0 %v1142_v22  ;;  %v2866_v38 = vld [vmem:[#allocation17_spill] sm:$0xff] }
 0x10e   :  { %1533 = vmatprep.subr.bf16.mxu0 %v1141_v23  ;;  %1565 = vmatprep.subr.bf16.mxu1 %v1149_v17 }
 0x10f   :  { %863 = vmax.xlane.f32.xlu1 %v2566_v13 }
 0x110   :  { %893 = vmax.xlane.f32.xlu0 %v2563_v36 }
 0x111   :  { %1566 = vmatpush3.bf16.msra.mxu1 %v1149_v17  ;;  %1534 = vmatpush3.bf16.msra.mxu0 %v1141_v23 }
 0x113   :  { %895 = vmax.xlane.f32.xlu1 %v2572_v6 }
 0x114   :  { %897 = vmax.xlane.f32.xlu0 %v2575_v14 }
 0x117   :  { %899 = vmax.xlane.f32.xlu1 %v2578_v33 }
 0x161   :  { %v842_v25 = vpop.xlane.xlu0 %841 }
 0x162   :  { %v903_v55 = vsub.f32 %v2859_v18, %v842_v25  ;;  %v2870_v25 = vld [vmem:[#allocation20_spill] sm:$0xff] }
 0x164   :  { %v937_v49 = vmul.f32 1.442695, %v903_v55  ;;  %v870_v63 = vpop.xlane.xlu1 %869 }
 0x165   :  { %v874_v28 = vpop.xlane.xlu0 %873  ;;  %v917_v61 = vsub.f32 %v2862_v32, %v870_v63  ;;  %v2871_v63 = vld [vmem:[#allocation22_spill] sm:$0xff] }
 0x166   :  { %1586 = vpow2.f32 %v937_v49  ;;  %v919_v47 = vsub.f32 %v2860_v40, %v874_v28 }
 0x167   :  { %v965_v42 = vmul.f32 1.442695, %v917_v61  ;;  %v2873_v61 = vld [vmem:[#allocation25_spill] sm:$0xff] }
 0x168   :  { %v969_v57 = vmul.f32 1.442695, %v919_v47  ;;  %v844_v7 = vpop.xlane.xlu1 %843 }
 0x169   :  { %v904_v4 = vsub.f32 %v2861_v29, %v844_v7  ;;  %v838_v2 = vpop.xlane.xlu0 %837  ;;  %v2872_v29 = vld [vmem:[#allocation24_spill] sm:$0xff] }
 0x16a   :  { %1588 = vpow2.f32 %v969_v57  ;;  %v901_v43 = vsub.f32 %v2863_v58, %v838_v2 }
 0x16b   :  { %v939_v16 = vmul.f32 1.442695, %v904_v4 }
 0x16c   :  { %v933_v35 = vmul.f32 1.442695, %v901_v43  ;;  %v876_v21 = vpop.xlane.xlu1 %875 }
 0x16d   :  { %1590 = vpow2.f32 %v939_v16  ;;  %v920_v10 = vsub.f32 %v2864_v44, %v876_v21  ;;  %v840_v56 = vpop.xlane.xlu0 %839 }
 0x16e   :  { %1592 = vpow2.f32 %v933_v35  ;;  %v902_v11 = vsub.f32 %v2865_v62, %v840_v56 }
 0x16f   :  { %v971_v27 = vmul.f32 1.442695, %v920_v10 }
 0x170   :  { %v872_v3 = vpop.xlane.xlu1 %871  ;;  %v935_v12 = vmul.f32 1.442695, %v902_v11 }
 0x171   :  { %1594 = vpow2.f32 %v971_v27  ;;  %v918_v22 = vsub.f32 %v2866_v38, %v872_v3  ;;  %v850_v15 = vpop.xlane.xlu0 %849 }
 0x172   :  { %1596 = vpow2.f32 %v965_v42  ;;  %v907_v1 = vsub.f32 %v2867_v52, %v850_v15 }
 0x173   :  { %v2590_v51 = vpop.eup %1586  ;;  %1598 = vpow2.f32 %v935_v12  ;;  %v967_v41 = vmul.f32 1.442695, %v918_v22 }
 0x174   :  { %v945_v46 = vmul.f32 1.442695, %v907_v1  ;;  %v852_v23 = vpop.xlane.xlu1 %851  ;;  %1001 = vadd.xlane.f32.xlu0 %v2590_v51 }
 0x175   :  { %v908_v17 = vsub.f32 %v2868_v45, %v852_v23  ;;  %v882_v0 = vpop.xlane.xlu0 %881 }
 0x176   :  { %1600 = vpow2.f32 %v945_v46  ;;  %v923_v50 = vsub.f32 %v2869_v59, %v882_v0 }
 0x177   :  { %v2595_v30 = vpop.eup %1588  ;;  %1602 = vpow2.f32 %v967_v41  ;;  %v947_v54 = vmul.f32 1.442695, %v908_v17 }
 0x178   :  { %v977_v8 = vmul.f32 1.442695, %v923_v50  ;;  %v884_v48 = vpop.xlane.xlu1 %883  ;;  %1033 = vadd.xlane.f32.xlu0 %v2595_v30 }
 0x179   :  { %v924_v18 = vsub.f32 %v2870_v25, %v884_v48  ;;  %v846_v55 = vpop.xlane.xlu0 %845 }
 0x17a   :  { %v2599_v49 = vpop.eup %1590  ;;  %1604 = vpow2.f32 %v977_v8  ;;  %v905_v28 = vsub.f32 %v2871_v63, %v846_v55 }
 0x17b   :  { %v2602_v40 = vpop.eup %1592  ;;  %1003 = vadd.xlane.f32.xlu1 %v2599_v49  ;;  %1606 = vpow2.f32 %v947_v54  ;;  %v979_v7 = vmul.f32 1.442695, %v924_v18 }
 0x17c   :  { %v941_v47 = vmul.f32 1.442695, %v905_v28  ;;  %v848_v57 = vpop.xlane.xlu1 %847  ;;  %997 = vadd.xlane.f32.xlu0 %v2602_v40 }
 0x17d   :  { %v906_v4 = vsub.f32 %v2872_v29, %v848_v57  ;;  %v878_v2 = vpop.xlane.xlu0 %877 }
 0x17e   :  { %v2607_v32 = vpop.eup %1594  ;;  %1608 = vpow2.f32 %v941_v47  ;;  %v921_v58 = vsub.f32 %v2873_v61, %v878_v2 }
 0x17f   :  { %v2610_v43 = vpop.eup %1596  ;;  %1035 = vadd.xlane.f32.xlu1 %v2607_v32  ;;  %1610 = vpow2.f32 %v979_v7  ;;  %v943_v21 = vmul.f32 1.442695, %v906_v4 }
 0x180   :  { %v973_v16 = vmul.f32 1.442695, %v921_v58  ;;  %v880_v35 = vpop.xlane.xlu1 %879  ;;  %1029 = vadd.xlane.f32.xlu0 %v2610_v43  ;;  %v2615_v56 = vpop.eup %1598 }
 0x181   :  { %v922_v44 = vsub.f32 %v2440_v34, %v880_v35  ;;  %v858_v10 = vpop.xlane.xlu0 %857 }
 0x182   :  { %1612 = vpow2.f32 %v973_v16  ;;  %v911_v42 = vsub.f32 %v2431_v5, %v858_v10 }
 0x183   :  { %v2618_v62 = vpop.eup %1600  ;;  %999 = vadd.xlane.f32.xlu1 %v2615_v56  ;;  %1614 = vpow2.f32 %v943_v21  ;;  %v975_v3 = vmul.f32 1.442695, %v922_v44 }
 0x184   :  { %v953_v11 = vmul.f32 1.442695, %v911_v42  ;;  %v860_v27 = vpop.xlane.xlu1 %859  ;;  %1009 = vadd.xlane.f32.xlu0 %v2618_v62  ;;  %v2623_v34 = vpop.eup %1602 }
 0x185   :  { %v912_v12 = vsub.f32 %v2455_v53, %v860_v27  ;;  %v890_v38 = vpop.xlane.xlu0 %889 }
 0x186   :  { %1616 = vpow2.f32 %v953_v11  ;;  %v927_v22 = vsub.f32 %v2463_v60, %v890_v38 }
 0x187   :  { %v2626_v15 = vpop.eup %1604  ;;  %1031 = vadd.xlane.f32.xlu1 %v2623_v34  ;;  %1618 = vpow2.f32 %v975_v3  ;;  %v955_v1 = vmul.f32 1.442695, %v912_v12 }
 0x188   :  { %v985_v5 = vmul.f32 1.442695, %v927_v22  ;;  %v892_v52 = vpop.xlane.xlu1 %891  ;;  %1041 = vadd.xlane.f32.xlu0 %v2626_v15  ;;  %v2631_v53 = vpop.eup %1606 }
 0x189   :  { %v928_v46 = vsub.f32 %v2494_v37, %v892_v52  ;;  %v854_v23 = vpop.xlane.xlu0 %853 }
 0x18a   :  { %1620 = vpow2.f32 %v985_v5  ;;  %v909_v41 = vsub.f32 %v2510_v39, %v854_v23 }
 0x18b   :  { %v2634_v45 = vpop.eup %1608  ;;  %1011 = vadd.xlane.f32.xlu1 %v2631_v53  ;;  %1622 = vpow2.f32 %v955_v1  ;;  %v987_v0 = vmul.f32 1.442695, %v928_v46 }
 0x18c   :  { %v949_v60 = vmul.f32 1.442695, %v909_v41  ;;  %v856_v17 = vpop.xlane.xlu1 %855  ;;  %1005 = vadd.xlane.f32.xlu0 %v2634_v45  ;;  %v2639_v37 = vpop.eup %1610 }
 0x18d   :  { %v910_v59 = vsub.f32 %v2527_v9, %v856_v17  ;;  %v886_v50 = vpop.xlane.xlu0 %885 }
 0x18e   :  { %1624 = vpow2.f32 %v949_v60  ;;  %v925_v8 = vsub.f32 %v2530_v24, %v886_v50 }
 0x18f   :  { %v2642_v48 = vpop.eup %1612  ;;  %1043 = vadd.xlane.f32.xlu1 %v2639_v37  ;;  %1626 = vpow2.f32 %v987_v0  ;;  %v951_v25 = vmul.f32 1.442695, %v910_v59 }
 0x190   :  { %v981_v39 = vmul.f32 1.442695, %v925_v8  ;;  %v888_v54 = vpop.xlane.xlu1 %887  ;;  %1037 = vadd.xlane.f32.xlu0 %v2642_v48  ;;  %v2647_v9 = vpop.eup %1614 }
 0x191   :  { %v926_v18 = vsub.f32 %v2542_v31, %v888_v54  ;;  %v866_v55 = vpop.xlane.xlu0 %865 }
 0x192   :  { %1628 = vpow2.f32 %v981_v39  ;;  %v915_v63 = vsub.f32 %v2538_v20, %v866_v55 }
 0x193   :  { %v2650_v28 = vpop.eup %1616  ;;  %1007 = vadd.xlane.f32.xlu1 %v2647_v9  ;;  %1630 = vpow2.f32 %v951_v25  ;;  %v983_v57 = vmul.f32 1.442695, %v926_v18 }
 0x194   :  { %v961_v24 = vmul.f32 1.442695, %v915_v63  ;;  %v868_v47 = vpop.xlane.xlu1 %867  ;;  %1017 = vadd.xlane.f32.xlu0 %v2650_v28  ;;  %v2655_v31 = vpop.eup %1618 }
 0x195   :  { %v916_v7 = vsub.f32 %v2551_v26, %v868_v47  ;;  %v862_v29 = vpop.xlane.xlu0 %861 }
 0x196   :  { %1632 = vpow2.f32 %v961_v24  ;;  %v913_v4 = vsub.f32 %v2556_v19, %v862_v29 }
 0x197   :  { %v2658_v2 = vpop.eup %1620  ;;  %1039 = vadd.xlane.f32.xlu1 %v2655_v31  ;;  %1634 = vpow2.f32 %v983_v57  ;;  %v963_v58 = vmul.f32 1.442695, %v916_v7 }
 0x198   :  { %v957_v20 = vmul.f32 1.442695, %v913_v4  ;;  %v864_v61 = vpop.xlane.xlu1 %863  ;;  %1049 = vadd.xlane.f32.xlu0 %v2658_v2  ;;  %v2663_v26 = vpop.eup %1622 }
 0x199   :  { %v914_v16 = vsub.f32 %v2566_v13, %v864_v61  ;;  %v894_v35 = vpop.xlane.xlu0 %893 }
 0x19a   :  { %1636 = vpow2.f32 %v957_v20  ;;  %v929_v21 = vsub.f32 %v2563_v36, %v894_v35 }
 0x19b   :  { %v2666_v44 = vpop.eup %1624  ;;  %1019 = vadd.xlane.f32.xlu1 %v2663_v26  ;;  %1638 = vpow2.f32 %v963_v58  ;;  %v959_v42 = vmul.f32 1.442695, %v914_v16 }
 0x19c   :  { %v989_v19 = vmul.f32 1.442695, %v929_v21  ;;  %v896_v10 = vpop.xlane.xlu1 %895  ;;  %1013 = vadd.xlane.f32.xlu0 %v2666_v44  ;;  %v2671_v13 = vpop.eup %1626 }
 0x19d   :  { %v930_v11 = vsub.f32 %v2572_v6, %v896_v10  ;;  %v898_v27 = vpop.xlane.xlu0 %897 }
 0x19e   :  { %1640 = vpow2.f32 %v989_v19  ;;  %v931_v3 = vsub.f32 %v2575_v14, %v898_v27 }
 0x19f   :  { %v2674_v12 = vpop.eup %1628  ;;  %1051 = vadd.xlane.f32.xlu1 %v2671_v13  ;;  %1642 = vpow2.f32 %v959_v42  ;;  %v991_v22 = vmul.f32 1.442695, %v930_v11 }
 0x1a0   :  { %v993_v36 = vmul.f32 1.442695, %v931_v3  ;;  %v900_v38 = vpop.xlane.xlu1 %899  ;;  %1045 = vadd.xlane.f32.xlu0 %v2674_v12  ;;  %v2679_v52 = vpop.eup %1630 }
 0x1a1   :  { %v932_v5 = vsub.f32 %v2578_v33, %v900_v38 }
 0x1a2   :  { %1644 = vpow2.f32 %v993_v36 }
 0x1a3   :  { %v2681_v6 = vpop.eup %1632  ;;  %1015 = vadd.xlane.f32.xlu1 %v2679_v52  ;;  %1646 = vpow2.f32 %v991_v22  ;;  %v995_v14 = vmul.f32 1.442695, %v932_v5 }
 0x1a4   :  { %1025 = vadd.xlane.f32.xlu0 %v2681_v6  ;;  %v2685_v1 = vpop.eup %1634 }
 0x1a5   :  { %1648 = vpow2.f32 %v995_v14 }
 0x1a7   :  { %v2687_v46 = vpop.eup %1636  ;;  %1047 = vadd.xlane.f32.xlu1 %v2685_v1 }
 0x1a8   :  { %1021 = vadd.xlane.f32.xlu0 %v2687_v46  ;;  %v2691_v33 = vpop.eup %1638 }
 0x1ab   :  { %v2693_v23 = vpop.eup %1640  ;;  %1027 = vadd.xlane.f32.xlu1 %v2691_v33 }
 0x1ac   :  { %1053 = vadd.xlane.f32.xlu0 %v2693_v23  ;;  %v2697_v41 = vpop.eup %1642 }
 0x1af   :  { %v2699_v60 = vpop.eup %1644  ;;  %1023 = vadd.xlane.f32.xlu1 %v2697_v41 }
 0x1b0   :  { %1057 = vadd.xlane.f32.xlu0 %v2699_v60  ;;  %v2703_v17 = vpop.eup %1646 }
 0x1b2   :  { %v2706_v0 = vpop.eup %1648 }
 0x1b3   :  { %1055 = vadd.xlane.f32.xlu1 %v2703_v17 }
 0x1b7   :  { %1059 = vadd.xlane.f32.xlu1 %v2706_v0 }
 0x1fd   :  { %v1002_v59 = vpop.xlane.xlu0 %1001 }
 0x201   :  { %v1034_v50 = vpop.xlane.xlu0 %1033 }
 0x204   :  { %v1004_v8 = vpop.xlane.xlu1 %1003 }
 0x205   :  { %v998_v39 = vpop.xlane.xlu0 %997  ;;  %1650 = vrcp.f32 %v1004_v8 }
 0x206   :  { %1652 = vrcp.f32 %v998_v39 }
 0x207   :  { %1654 = vrcp.f32 %v1002_v59 }
 0x208   :  { %v1036_v54 = vpop.xlane.xlu1 %1035 }
 0x209   :  { %v1030_v25 = vpop.xlane.xlu0 %1029 }
 0x20c   :  { %v1000_v18 = vpop.xlane.xlu1 %999 }
 0x20d   :  { %1656 = vrcp.f32 %v1000_v18  ;;  %v1010_v55 = vpop.xlane.xlu0 %1009 }
 0x20e   :  { %1658 = vrcp.f32 %v1036_v54 }
 0x20f   :  { %1660 = vrcp.f32 %v1030_v25 }
 0x210   :  { %1662 = vrcp.f32 %v1034_v50  ;;  %v1032_v63 = vpop.xlane.xlu1 %1031 }
 0x211   :  { %1664 = vrcp.f32 %v1032_v63  ;;  %v1042_v24 = vpop.xlane.xlu0 %1041 }
 0x212   :  { %v1651_v7 = vpop.eup %1650 }
 0x213   :  { %v1653_v29 = vpop.eup %1652  ;;  %v1068_v16 = vmul.f32 %v1651_v7, %v2599_v49 }
 0x214   :  { %v1012_v47 = vpop.xlane.xlu1 %1011  ;;  %v1655_v20 = vpop.eup %1654  ;;  %v1062_v21 = vmul.f32 %v1653_v29, %v2602_v40 }
 0x215   :  { %v1006_v57 = vpop.xlane.xlu0 %1005  ;;  %1666 = vrcp.f32 %v1012_v47  ;;  %v1066_v11 = vmul.f32 %v1655_v20, %v2590_v51 }
 0x216   :  { %1668 = vrcp.f32 %v1006_v57 }
 0x217   :  { %1670 = vrcp.f32 %v1010_v55  ;;  %v1126_v22 = vpack.c.bf16 %v1068_v16, %v1066_v11 }
 0x218   :  { %v1044_v4 = vpop.xlane.xlu1 %1043 }
 0x219   :  { %v1038_v61 = vpop.xlane.xlu0 %1037 }
 0x21a   :  { %v1657_v58 = vpop.eup %1656 }
 0x21b   :  { %v1659_v35 = vpop.eup %1658  ;;  %v1064_v19 = vmul.f32 %v1657_v58, %v2615_v56 }
 0x21c   :  { %v1661_v10 = vpop.eup %1660  ;;  %v1008_v42 = vpop.xlane.xlu1 %1007  ;;  %v1100_v49 = vmul.f32 %v1659_v35, %v2607_v32 }
 0x21d   :  { %v1663_v27 = vpop.eup %1662  ;;  %1672 = vrcp.f32 %v1008_v42  ;;  %v1018_v3 = vpop.xlane.xlu0 %1017  ;;  %v1125_v36 = vpack.c.bf16 %v1064_v19, %v1062_v21  ;;  %v1094_v40 = vmul.f32 %v1661_v10, %v2610_v43 }
 0x21e   :  { %v1665_v38 = vpop.eup %1664  ;;  %1674 = vrcp.f32 %v1044_v4  ;;  %v1098_v51 = vmul.f32 %v1663_v27, %v2595_v30 }
 0x21f   :  { %1676 = vrcp.f32 %v1038_v61  ;;  %1535 = vmatprep.mubr.bf16.mxu0 %v1125_v36  ;;  %v1096_v56 = vmul.f32 %v1665_v38, %v2623_v34 }
 0x220   :  { %1678 = vrcp.f32 %v1042_v24  ;;  %1536 = vmatmul.mubr.bf16.vlgmr.msra.gmra.mxu0 %v1126_v22  ;;  %v1040_v5 = vpop.xlane.xlu1 %1039  ;;  %v1134_v50 = vpack.c.bf16 %v1100_v49, %v1098_v51 }
 0x221   :  { %1680 = vrcp.f32 %v1040_v5  ;;  %v1050_v14 = vpop.xlane.xlu0 %1049  ;;  %v1133_v59 = vpack.c.bf16 %v1096_v56, %v1094_v40 }
 0x222   :  { %v1667_v32 = vpop.eup %1666 }
 0x223   :  { %1567 = vmatprep.mubr.bf16.mxu1 %v1133_v59  ;;  %v1669_v54 = vpop.eup %1668  ;;  %v1076_v34 = vmul.f32 %v1667_v32, %v2631_v53 }
 0x224   :  { %1568 = vmatmul.mubr.bf16.vlgmr.msra.gmra.mxu1 %v1134_v50  ;;  %v1020_v8 = vpop.xlane.xlu1 %1019  ;;  %v1671_v18 = vpop.eup %1670  ;;  %v1070_v30 = vmul.f32 %v1669_v54, %v2634_v45 }
 0x225   :  { %v1014_v39 = vpop.xlane.xlu0 %1013  ;;  %1682 = vrcp.f32 %v1020_v8  ;;  %v1074_v7 = vmul.f32 %v1671_v18, %v2618_v62 }
 0x226   :  { %1684 = vrcp.f32 %v1014_v39 }
 0x227   :  { %1686 = vrcp.f32 %v1018_v3  ;;  %v1128_v58 = vpack.c.bf16 %v1076_v34, %v1074_v7 }
 0x228   :  { %v1052_v25 = vpop.xlane.xlu1 %1051 }
 0x229   :  { %v1046_v43 = vpop.xlane.xlu0 %1045 }
 0x22a   :  { %v1673_v55 = vpop.eup %1672 }
 0x22b   :  { %v1675_v63 = vpop.eup %1674  ;;  %v1072_v24 = vmul.f32 %v1673_v55, %v2647_v9 }
 0x22c   :  { %v1677_v47 = vpop.eup %1676  ;;  %v1016_v57 = vpop.xlane.xlu1 %1015  ;;  %v1108_v53 = vmul.f32 %v1675_v63, %v2639_v37 }
 0x22d   :  { %v1679_v29 = vpop.eup %1678  ;;  %1688 = vrcp.f32 %v1016_v57  ;;  %v1026_v4 = vpop.xlane.xlu0 %1025  ;;  %v1127_v20 = vpack.c.bf16 %v1072_v24, %v1070_v30  ;;  %v1102_v45 = vmul.f32 %v1677_v47, %v2642_v48 }
 0x22e   :  { %v1681_v61 = vpop.eup %1680  ;;  %1690 = vrcp.f32 %v1052_v25  ;;  %v1106_v62 = vmul.f32 %v1679_v29, %v2626_v15 }
 0x22f   :  { %1692 = vrcp.f32 %v1046_v43  ;;  %1539 = vmatprep.mubr.bf16.mxu0 %v1127_v20  ;;  %v1104_v9 = vmul.f32 %v1681_v61, %v2655_v31 }
 0x230   :  { %1694 = vrcp.f32 %v1050_v14  ;;  %1540 = vmatmul.mubr.bf16.gmra.mxu0 %v1128_v58  ;;  %v1048_v16 = vpop.xlane.xlu1 %1047  ;;  %v1136_v19 = vpack.c.bf16 %v1108_v53, %v1106_v62 }
 0x231   :  { %1696 = vrcp.f32 %v1048_v16  ;;  %v1022_v35 = vpop.xlane.xlu0 %1021  ;;  %v1135_v21 = vpack.c.bf16 %v1104_v9, %v1102_v45 }
 0x232   :  { %v1683_v42 = vpop.eup %1682 }
 0x233   :  { %1571 = vmatprep.mubr.bf16.mxu1 %v1135_v21  ;;  %v1685_v11 = vpop.eup %1684  ;;  %v1084_v3 = vmul.f32 %v1683_v42, %v2663_v26 }
 0x234   :  { %1572 = vmatmul.mubr.bf16.gmra.mxu1 %v1136_v19  ;;  %v1028_v10 = vpop.xlane.xlu1 %1027  ;;  %v1687_v31 = vpop.eup %1686  ;;  %v1078_v36 = vmul.f32 %v1685_v11, %v2666_v44 }
 0x235   :  { %1698 = vrcp.f32 %v1028_v10  ;;  %v1054_v37 = vpop.xlane.xlu0 %1053  ;;  %v1082_v56 = vmul.f32 %v1687_v31, %v2650_v28 }
 0x236   :  { %1700 = vrcp.f32 %v1022_v35 }
 0x237   :  { %1702 = vrcp.f32 %v1026_v4  ;;  %v1130_v59 = vpack.c.bf16 %v1084_v3, %v1082_v56 }
 0x238   :  { %v1024_v48 = vpop.xlane.xlu1 %1023 }
 0x239   :  { %1704 = vrcp.f32 %v1024_v48  ;;  %v1058_v49 = vpop.xlane.xlu0 %1057 }
 0x23a   :  { %v1689_v27 = vpop.eup %1688  ;;  %1706 = vrcp.f32 %v1054_v37 }
 0x23b   :  { %v1691_v15 = vpop.eup %1690  ;;  %v1080_v38 = vmul.f32 %v1689_v27, %v2679_v52 }
 0x23c   :  { %v1693_v22 = vpop.eup %1692  ;;  %v1056_v40 = vpop.xlane.xlu1 %1055  ;;  %v1116_v50 = vmul.f32 %v1691_v15, %v2671_v13 }
 0x23d   :  { %v1695_v5 = vpop.eup %1694  ;;  %1708 = vrcp.f32 %v1056_v40  ;;  %v1129_v51 = vpack.c.bf16 %v1080_v38, %v1078_v36  ;;  %v1110_v26 = vmul.f32 %v1693_v22, %v2674_v12 }
 0x23e   :  { %v1697_v14 = vpop.eup %1696  ;;  %1710 = vrcp.f32 %v1058_v49  ;;  %v1114_v8 = vmul.f32 %v1695_v5, %v2658_v2 }
 0x23f   :  { %1543 = vmatprep.mubr.bf16.mxu0 %v1129_v51  ;;  %v1112_v44 = vmul.f32 %v1697_v14, %v2685_v1 }
 0x240   :  { %1544 = vmatmul.mubr.bf16.gmra.mxu0 %v1130_v59  ;;  %v1060_v52 = vpop.xlane.xlu1 %1059  ;;  %v1138_v28 = vpack.c.bf16 %v1116_v50, %v1114_v8 }
 0x241   :  { %1712 = vrcp.f32 %v1060_v52  ;;  %v1137_v39 = vpack.c.bf16 %v1112_v44, %v1110_v26 }
 0x242   :  { %v1699_v32 = vpop.eup %1698 }
 0x243   :  { %1575 = vmatprep.mubr.bf16.mxu1 %v1137_v39  ;;  %v1701_v54 = vpop.eup %1700  ;;  %v1092_v13 = vmul.f32 %v1699_v32, %v2691_v33 }
 0x244   :  { %1576 = vmatmul.mubr.bf16.gmra.mxu1 %v1138_v28  ;;  %v1703_v25 = vpop.eup %1702  ;;  %v1086_v43 = vmul.f32 %v1701_v54, %v2687_v46 }
 0x245   :  { %v1090_v55 = vmul.f32 %v1703_v25, %v2681_v6 }
 0x246   :  { %v1705_v18 = vpop.eup %1704 }
 0x247   :  { %v1088_v12 = vmul.f32 %v1705_v18, %v2697_v41  ;;  %v1707_v1 = vpop.eup %1706  ;;  %v1132_v63 = vpack.c.bf16 %v1092_v13, %v1090_v55 }
 0x248   :  { %v1118_v30 = vmul.f32 %v1707_v1, %v2693_v23 }
 0x249   :  { %v1131_v34 = vpack.c.bf16 %v1088_v12, %v1086_v43 }
 0x24a   :  { %v1709_v2 = vpop.eup %1708 }
 0x24b   :  { %1547 = vmatprep.mubr.bf16.mxu0 %v1131_v34  ;;  %v1120_v24 = vmul.f32 %v1709_v2, %v2703_v17  ;;  %v1711_v47 = vpop.eup %1710 }
 0x24c   :  { %1548 = vmatmul.mubr.bf16.gmra.mxu0 %v1132_v63  ;;  %v1122_v46 = vmul.f32 %v1711_v47, %v2699_v60 }
 0x24d   :  { %v1139_v57 = vpack.c.bf16 %v1120_v24, %v1118_v30 }
 0x24e   :  { %v1713_v7 = vpop.eup %1712 }
 0x24f   :  { %1579 = vmatprep.mubr.bf16.mxu1 %v1139_v57  ;;  %v1124_v33 = vmul.f32 %v1713_v7, %v2706_v0 }
 0x251   :  { %v1140_v41 = vpack.c.bf16 %v1124_v33, %v1122_v46 }
 0x253   :  { %1580 = vmatmul.mubr.bf16.gmra.mxu1 %v1140_v41 }
 0x2e0   :  { %v1537_v6 = vpop.f32.mrf.mxu0 }
 0x2e1   :  { %1353 = vst [vmem:[#allocation3 + $0x10] sm:$0xff] %v1537_v6 }
 0x2e2   :  { %v1191_v29 = vpop.f32.mrf.mxu0 }
 0x2e3   :  { %1351 = vst [vmem:[#allocation3] sm:$0xff] %v1191_v29 }
 0x2e4   :  { %v1538_v4 = vpop.f32.mrf.mxu0  ;;  %v1569_v20 = vpop.f32.mrf.mxu1 }
 0x2e5   :  { %1354 = vst [vmem:[#allocation3 + $0x18] sm:$0xff] %v1538_v4  ;;  %1369 = vst [vmem:[#allocation3 + $0x90] sm:$0xff] %v1569_v20 }
 0x2e6   :  { %v1194_v23 = vpop.f32.mrf.mxu0  ;;  %v1288_v17 = vpop.f32.mrf.mxu1 }
 0x2e7   :  { %1352 = vst [vmem:[#allocation3 + $0x8] sm:$0xff] %v1194_v23  ;;  %1367 = vst [vmem:[#allocation3 + $0x80] sm:$0xff] %v1288_v17 }
 0x2e8   :  { %v1570_v61 = vpop.f32.mrf.mxu1 }
 0x2e9   :  { %1370 = vst [vmem:[#allocation3 + $0x98] sm:$0xff] %v1570_v61 }
 0x2ea   :  { %v1291_v58 = vpop.f32.mrf.mxu1 }
 0x2eb   :  { %1368 = vst [vmem:[#allocation3 + $0x88] sm:$0xff] %v1291_v58 }
 0x2f0   :  { %v1541_v60 = vpop.f32.mrf.mxu0 }
 0x2f1   :  { %1357 = vst [vmem:[#allocation3 + $0x30] sm:$0xff] %v1541_v60 }
 0x2f2   :  { %v1207_v0 = vpop.f32.mrf.mxu0 }
 0x2f3   :  { %1355 = vst [vmem:[#allocation3 + $0x20] sm:$0xff] %v1207_v0 }
 0x2f4   :  { %v1542_v53 = vpop.f32.mrf.mxu0  ;;  %v1573_v45 = vpop.f32.mrf.mxu1 }
 0x2f5   :  { %1358 = vst [vmem:[#allocation3 + $0x38] sm:$0xff] %v1542_v53  ;;  %1373 = vst [vmem:[#allocation3 + $0xb0] sm:$0xff] %v1573_v45 }
 0x2f6   :  { %v1210_v9 = vpop.f32.mrf.mxu0  ;;  %v1304_v16 = vpop.f32.mrf.mxu1 }
 0x2f7   :  { %1356 = vst [vmem:[#allocation3 + $0x28] sm:$0xff] %v1210_v9  ;;  %1371 = vst [vmem:[#allocation3 + $0xa0] sm:$0xff] %v1304_v16 }
 0x2f8   :  { %v1574_v62 = vpop.f32.mrf.mxu1 }
 0x2f9   :  { %1374 = vst [vmem:[#allocation3 + $0xb8] sm:$0xff] %v1574_v62 }
 0x2fa   :  { %v1307_v35 = vpop.f32.mrf.mxu1 }
 0x2fb   :  { %1372 = vst [vmem:[#allocation3 + $0xa8] sm:$0xff] %v1307_v35 }
 0x300   :  { %v1545_v21 = vpop.f32.mrf.mxu0 }
 0x301   :  { %1361 = vst [vmem:[#allocation3 + $0x50] sm:$0xff] %v1545_v21 }
 0x302   :  { %v1223_v19 = vpop.f32.mrf.mxu0 }
 0x303   :  { %1359 = vst [vmem:[#allocation3 + $0x40] sm:$0xff] %v1223_v19 }
 0x304   :  { %v1546_v10 = vpop.f32.mrf.mxu0  ;;  %v1577_v37 = vpop.f32.mrf.mxu1 }
 0x305   :  { %1362 = vst [vmem:[#allocation3 + $0x58] sm:$0xff] %v1546_v10  ;;  %1377 = vst [vmem:[#allocation3 + $0xd0] sm:$0xff] %v1577_v37 }
 0x306   :  { %v1226_v42 = vpop.f32.mrf.mxu0  ;;  %v1320_v11 = vpop.f32.mrf.mxu1 }
 0x307   :  { %1360 = vst [vmem:[#allocation3 + $0x48] sm:$0xff] %v1226_v42  ;;  %1375 = vst [vmem:[#allocation3 + $0xc0] sm:$0xff] %v1320_v11 }
 0x308   :  { %v1578_v48 = vpop.f32.mrf.mxu1 }
 0x309   :  { %1378 = vst [vmem:[#allocation3 + $0xd8] sm:$0xff] %v1578_v48 }
 0x30a   :  { %v1323_v31 = vpop.f32.mrf.mxu1 }
 0x30b   :  { %1376 = vst [vmem:[#allocation3 + $0xc8] sm:$0xff] %v1323_v31 }
 0x30c   :  { %v1549_v27 = vpop.f32.mrf.mxu0 }
 0x30d   :  { %1365 = vst [vmem:[#allocation3 + $0x70] sm:$0xff] %v1549_v27 }
 0x30e   :  { %v1239_v3 = vpop.f32.mrf.mxu0 }
 0x30f   :  { %1363 = vst [vmem:[#allocation3 + $0x60] sm:$0xff] %v1239_v3 }
 0x310   :  { %v1550_v15 = vpop.f32.mrf.mxu0 }
 0x311   :  { %1366 = vst [vmem:[#allocation3 + $0x78] sm:$0xff] %v1550_v15 }
 0x312   :  { %v1242_v36 = vpop.f32.mrf.mxu0 }
 0x313   :  { %1364 = vst [vmem:[#allocation3 + $0x68] sm:$0xff] %v1242_v36  ;;  %v1581_v38 = vpop.f32.mrf.mxu1 }
 0x314   :  { %1381 = vst [vmem:[#allocation3 + $0xf0] sm:$0xff] %v1581_v38 }
 0x315   :  { %v1336_v22 = vpop.f32.mrf.mxu1 }
 0x316   :  { %1379 = vst [vmem:[#allocation3 + $0xe0] sm:$0xff] %v1336_v22 }
 0x317   :  { %v1582_v49 = vpop.f32.mrf.mxu1 }
 0x318   :  { %1382 = vst [vmem:[#allocation3 + $0xf8] sm:$0xff] %v1582_v49 }
 0x319   :  { %v1339_v40 = vpop.f32.mrf.mxu1 }
 0x31a   :  { %1380 = vst [vmem:[#allocation3 + $0xe8] sm:$0xff] %v1339_v40 }
 0x31b   :  { %1725 = shalt.err (!%p1722_p4)
}
 0x31c   :  { %s1737_s29 = smov 128   ;;  %s1738_s30 = smov 8  }
 0x31d   :  { %1394 = dma.vmem_to_hbm [thread:$0]  %s1389_s28, 4096, %s2747_s3, [#allocation4], %s1737_s29, %s1737_s29, %s1738_s30  }
 0x31e   :  { %1734 = dma.done.wait [#allocation4], 4096  }
 0x31f   :  { %1735 = vsyncadd [#allocation4], 4294963200 }
 0x320   :  { %1398 = vsyncpa [#allocation4], 1 }

</bundles_post_ra>
